<compile_context>
chip_gen: v7x
topology: tpu7x:2x2x1
jax: 0.10.0
libtpu: 0.0.40
codegen_flags: <defaults>
</compile_context>

<pallas_src>
import functools

import jax
import jax.numpy as jnp
from jax.experimental import pallas as pl
from jax.experimental.pallas import tpu as pltpu

LANE = 128          # vreg lane width; all feature dims are padded to this
NEG_SLOPE = 0.01    # torch.nn.LeakyReLU default
BN_EPS = 1e-5       # torch.nn.BatchNorm1d default

# packed weight-matrix indices  (w_pack: [13, LANE, LANE], stored [in, out], zero padded)
(W_PRE, W_L1, W_R1, W_HH1,
 W_L2, W_R2, W_HH2,
 W_L3, W_R3, W_OO, W_OH, W_H1, W_FC2) = range(13)

# packed bias / row-vector indices  (v_pack: [18, 1, LANE], zero padded)
(V_BPRE, V_WE1, V_BE1, V_BL1, V_BHH1,
 V_WE2, V_BE2, V_BL2, V_BHH2,
 V_WE3, V_BE3, V_BL3, V_BOO, V_BOH,
 V_GAMMA, V_BETA, V_BH1, V_BFC2) = range(18)


def _round_up(x, m):
    return ((x + m - 1) // m) * m


def _model_kernel(src_ref, dst_ref, ea_ref,          # SMEM: int32[E], int32[E], f32[E]
                  x_ref, invdeg_ref, pool_ref,       # VMEM: [Np,128], [Np,1], [Gp,Np]
                  w_ref, v_ref,                      # VMEM packed params
                  res_ref, pred_ref,                 # outputs: [Np,128], [Gp,128]
                  h_nodes, agg,                      # VMEM scratch: [Np,128] x2
                  *, n_edges, n_graphs):
    relu = lambda t: jnp.maximum(t, 0.0)
    lrelu = lambda t: jnp.where(t > 0.0, t, NEG_SLOPE * t)

    def matw(a, wi):
        # all weights are zero-padded to [128,128]; padded lanes stay exactly 0
        return jnp.dot(a, w_ref[wi], preferred_element_type=jnp.float32)

    x = x_ref[...]

    # --- ResNet head: res_out = fc2(sage_input)  (no activation in the reference) ---
    res_ref[...] = matw(x, W_FC2) + v_ref[V_BFC2]

    # --- SAGEConv_edge: mean-aggregate relu(x_j + lin_e(edge_attr)), then lin_l + lin_r ---
    def sage_conv(h, wl, wr, vwe, vbe, vbl):
        we = v_ref[vwe]                      # [1,128] lin_e weight row (K=1 -> VPU broadcast)
        be = v_ref[vbe]                      # [1,128]
        h_nodes[...] = h
        agg[...] = jnp.zeros_like(agg)

        def edge_body(e, carry):
            s = src_ref[e]                                   # source node index (SMEM scalar)
            d = dst_ref[e]                                   # target node index
            ef = ea_ref[e] * we + be                         # lin_e(edge_attr) on the VPU
            msg = relu(h_nodes[pl.ds(s, 1), :] + ef)         # gather x_j, form message [1,128]
            agg[pl.ds(d, 1), :] = agg[pl.ds(d, 1), :] + msg  # scatter-add at target node
            return carry

        jax.lax.fori_loop(0, n_edges, edge_body, 0)

        mean_agg = agg[...] * invdeg_ref[...]                # mean aggregation (1/in_deg)
        return matw(mean_agg, wl) + v_ref[vbl] + matw(h, wr)

    h = relu(matw(x, W_PRE) + v_ref[V_BPRE])                         # prelin + relu
    h = relu(sage_conv(h, W_L1, W_R1, V_WE1, V_BE1, V_BL1))          # conv1 + relu
    h = lrelu(matw(h, W_HH1) + v_ref[V_BHH1])                        # lin_hh1 + leakyrelu
    h = relu(sage_conv(h, W_L2, W_R2, V_WE2, V_BE2, V_BL2))          # conv2 + relu
    h = lrelu(matw(h, W_HH2) + v_ref[V_BHH2])                        # lin_hh2 + leakyrelu
    h = relu(sage_conv(h, W_L3, W_R3, V_WE3, V_BE3, V_BL3))          # conv3 + relu
    h = lrelu(matw(h, W_OO) + v_ref[V_BOO])                          # lin_oo + leakyrelu

    # global mean pool (tiny [Gp,Np] @ [Np,128]) -> lin_oh
    g = jnp.dot(pool_ref[...], h, preferred_element_type=jnp.float32)
    g = matw(g, W_OH) + v_ref[V_BOH]

    # BatchNorm1d (training mode: batch statistics over the REAL graphs only, biased variance).
    # TODO(synk): running_mean/var buffer updates are a training side effect and not modeled.
    g_pad = pool_ref.shape[0]
    gmask = (jax.lax.broadcasted_iota(jnp.int32, (g_pad, LANE), 0)
             < n_graphs).astype(jnp.float32)
    inv_n = 1.0 / float(n_graphs)
    mu = jnp.sum(g * gmask, axis=0, keepdims=True) * inv_n
    dg = (g - mu) * gmask
    var = jnp.sum(dg * dg, axis=0, keepdims=True) * inv_n
    g = (g - mu) * jax.lax.rsqrt(var + BN_EPS) * v_ref[V_GAMMA] + v_ref[V_BETA]
    g = lrelu(g)

    pred_ref[...] = relu(matw(g, W_H1) + v_ref[V_BH1])               # lin_h1 + relu


def model_mnist_forward(sage_input, edge_index, edge_attr, batch, packed_params, num_graphs):
    """Wrapper: pad to lane-dense shapes, build tiny aux arrays, call the fused kernel."""
    w_pack, v_pack = packed_params
    n, cin = sage_input.shape
    e = edge_index.shape[1]
    n_pad = _round_up(n, 8)
    g_pad = _round_up(num_graphs, 8)

    src = edge_index[0].astype(jnp.int32)
    dst = edge_index[1].astype(jnp.int32)
    ea = edge_attr.reshape(-1).astype(jnp.float32)       # edge feature dim is 1

    # node features padded to the 128-lane width (padded lanes/rows stay exactly zero)
    x_p = jnp.zeros((n_pad, LANE), jnp.float32).at[:n, :cin].set(sage_input)

    # 1 / in-degree for mean aggregation (isolated nodes -> contribution stays 0)
    in_deg = jnp.zeros((n_pad,), jnp.float32).at[dst].add(1.0)
    inv_deg = (1.0 / jnp.maximum(in_deg, 1.0)).reshape(n_pad, 1)

    # global-mean-pool matrix [G_pad, N_pad] (tiny: O(G*N), not O(E*N))
    batch_oh = jax.nn.one_hot(batch, num_graphs, dtype=jnp.float32)      # [n, G]
    cnt = jnp.maximum(batch_oh.sum(axis=0), 1.0)
    pool = jnp.zeros((g_pad, n_pad), jnp.float32).at[:num_graphs, :n].set(
        (batch_oh / cnt[None, :]).T)

    # VMEM budget sized from the actual buffers (inputs + scratch + outputs) with headroom
    vmem_inputs = (x_p, inv_deg, pool, w_pack, v_pack)
    vmem_bytes = sum(int(a.size) * a.dtype.itemsize for a in vmem_inputs)
    vmem_bytes += (2 * n_pad * LANE + n_pad * LANE + g_pad * LANE) * 4
    vmem_limit = int(min(4 * vmem_bytes + (16 << 20), 64 << 20))

    kernel = functools.partial(_model_kernel, n_edges=e, n_graphs=num_graphs)
    smem = pl.BlockSpec(memory_space=pltpu.MemorySpace.SMEM)
    vmem = pl.BlockSpec(memory_space=pltpu.MemorySpace.VMEM)

    res_out, pred = pl.pallas_call(
        kernel,
        out_shape=(jax.ShapeDtypeStruct((n_pad, LANE), jnp.float32),
                   jax.ShapeDtypeStruct((g_pad, LANE), jnp.float32)),
        in_specs=[smem, smem, smem, vmem, vmem, vmem, vmem, vmem],
        out_specs=(vmem, vmem),
        scratch_shapes=[pltpu.VMEM((n_pad, LANE), jnp.float32),   # node features for gather
                        pltpu.VMEM((n_pad, LANE), jnp.float32)],  # scatter accumulator
        compiler_params=pltpu.CompilerParams(vmem_limit_bytes=vmem_limit),
    )(src, dst, ea, x_p, inv_deg, pool, w_pack, v_pack)

    return res_out[:n, :1], pred[:num_graphs, :1]


def init_params(key, cin, ch, cout):
    """Deterministic synthetic parameters (shapes from SAGE_edge / ResNet.fc2)."""
    keys = iter(jax.random.split(key, 64))

    def lin(i, o, bias=True):
        w = jax.random.normal(next(keys), (i, o), jnp.float32) * (1.0 / jnp.sqrt(i))
        b = (jax.random.normal(next(keys), (o,), jnp.float32) * 0.01) if bias else None
        return w, b

    p = {}
    p["prelin"] = lin(cin, ch)
    p["conv1_e"] = lin(1, ch)
    p["conv1_l"] = lin(ch, ch)
    p["conv1_r"] = lin(ch, ch, bias=False)
    p["hh1"] = lin(ch, ch)
    p["conv2_e"] = lin(1, ch)
    p["conv2_l"] = lin(ch, ch)
    p["conv2_r"] = lin(ch, ch, bias=False)
    p["hh2"] = lin(ch, ch)
    p["conv3_e"] = lin(1, ch)
    p["conv3_l"] = lin(ch, cout)
    p["conv3_r"] = lin(ch, cout, bias=False)
    p["oo"] = lin(cout, cout)
    p["oh"] = lin(cout, ch)
    p["h1"] = lin(ch, 1)
    p["fc2"] = lin(cin, 1)          # ResNet.fc2 head applied to sage_input
    p["gamma"] = jnp.ones((ch,), jnp.float32)    # norm_h gamma
    p["beta"] = jnp.zeros((ch,), jnp.float32)    # norm_h beta
    return p


def pack_params(p):
    """Pack ~30 tiny tensors into two lane-padded stacks (2 DMAs instead of ~30)."""
    def padw(w):
        return jnp.zeros((LANE, LANE), jnp.float32).at[:w.shape[0], :w.shape[1]].set(w)

    def padv(v):
        v = jnp.reshape(v, (1, -1))
        return jnp.zeros((1, LANE), jnp.float32).at[:, :v.shape[1]].set(v)

    w_order = ["prelin", "conv1_l", "conv1_r", "hh1",
               "conv2_l", "conv2_r", "hh2",
               "conv3_l", "conv3_r", "oo", "oh", "h1", "fc2"]
    w_pack = jnp.stack([padw(p[k][0]) for k in w_order])          # [13, 128, 128]

    v_list = [p["prelin"][1],
              p["conv1_e"][0], p["conv1_e"][1], p["conv1_l"][1], p["hh1"][1],
              p["conv2_e"][0], p["conv2_e"][1], p["conv2_l"][1], p["hh2"][1],
              p["conv3_e"][0], p["conv3_e"][1], p["conv3_l"][1],
              p["oo"][1], p["oh"][1],
              p["gamma"], p["beta"],
              p["h1"][1], p["fc2"][1]]
    v_pack = jnp.stack([padv(v) for v in v_list])                 # [18, 1, 128]
    return w_pack, v_pack


if __name__ == "__main__":
    key = jax.random.PRNGKey(0)
    k_x, k_e, k_ea, k_p = jax.random.split(key, 4)

    N, E, G = 8, 16, 2
    CIN, CH, COUT = 16, 32, 16   # ResNet.fc emits 16-dim sage_input

    # synthetic stand-in for the ResNet `sage_input` output (see TODO at top of file)
    sage_input = jax.random.normal(k_x, (N, CIN), jnp.float32)

    src = jax.random.randint(k_e, (E,), 0, N)
    dst = (src + 1 + jax.random.randint(jax.random.fold_in(k_e, 1), (E,), 0, N - 1)) % N
    edge_index = jnp.stack([src, dst]).astype(jnp.int32)   # row0 = source j, row1 = target i
    edge_attr = jax.random.normal(k_ea, (E, 1), jnp.float32)
    batch = jnp.array([0, 0, 0, 0, 1, 1, 1, 1], jnp.int32)  # 2 graphs of 4 nodes

    params = pack_params(init_params(k_p, CIN, CH, COUT))

    res_out, predict = model_mnist_forward(sage_input, edge_index, edge_attr, batch, params, G)
    jax.block_until_ready((res_out, predict))
    assert res_out.shape == (N, 1)
    assert predict.shape == (G, 1)
    print("KERNEL_OK")
</pallas_src>

<mosaic_0001>
module attributes {stable_mosaic.version = 11 : i64} {
  func.func @_model_kernel(%arg0: memref<16xi32, #tpu.memory_space<smem>>, %arg1: memref<16xi32, #tpu.memory_space<smem>>, %arg2: memref<16xf32, #tpu.memory_space<smem>>, %arg3: memref<8x128xf32, #tpu.memory_space<vmem>>, %arg4: memref<8x1xf32, #tpu.memory_space<vmem>>, %arg5: memref<8x8xf32, #tpu.memory_space<vmem>>, %arg6: memref<13x128x128xf32, #tpu.memory_space<vmem>>, %arg7: memref<18x1x128xf32, #tpu.memory_space<vmem>>, %arg8: memref<8x128xf32, #tpu.memory_space<vmem>>, %arg9: memref<8x128xf32, #tpu.memory_space<vmem>>, %arg10: memref<8x128xf32, #tpu.memory_space<vmem>>, %arg11: memref<8x128xf32, #tpu.memory_space<vmem>>) attributes {dimension_semantics = [], scalar_prefetch = 0 : i64, scratch_operands = 2 : i64, tpu.core_type = #tpu.core_type<tc>} {
    %c0 = arith.constant 0 : index
    %c0_0 = arith.constant 0 : index
    %0 = vector.load %arg3[%c0, %c0_0] : memref<8x128xf32, #tpu.memory_space<vmem>>, vector<8x128xf32>
    %c12 = arith.constant 12 : index
    %c0_1 = arith.constant 0 : index
    %c0_2 = arith.constant 0 : index
    %1 = vector.load %arg6[%c12, %c0_1, %c0_2] : memref<13x128x128xf32, #tpu.memory_space<vmem>>, vector<1x128x128xf32>
    %2 = vector.shape_cast %1 : vector<1x128x128xf32> to vector<128x128xf32>
    %cst = arith.constant dense<0.000000e+00> : vector<8x128xf32>
    %3 = tpu.matmul %0, %2, %cst {dimension_numbers = #tpu.dot_dimension_numbers<[1], [0], [0], [1], [0, 0, 1, 1], [], []>} : vector<8x128xf32>, vector<128x128xf32>, vector<8x128xf32> -> vector<8x128xf32>
    %c17 = arith.constant 17 : index
    %c0_3 = arith.constant 0 : index
    %c0_4 = arith.constant 0 : index
    %4 = vector.load %arg7[%c17, %c0_3, %c0_4] : memref<18x1x128xf32, #tpu.memory_space<vmem>>, vector<1x1x128xf32>
    %5 = vector.shape_cast %4 : vector<1x1x128xf32> to vector<1x128xf32>
    %6 = vector.broadcast %5 : vector<1x128xf32> to vector<8x128xf32>
    %7 = arith.addf %3, %6 : vector<8x128xf32>
    %c0_5 = arith.constant 0 : index
    %c0_6 = arith.constant 0 : index
    %8 = vector.load %arg8[%c0_5, %c0_6] : memref<8x128xf32, #tpu.memory_space<vmem>>, vector<8x128xf32>
    tpu.vector_store %arg8[%c0_5, %c0_6], %7 {strides = array<i32>} : memref<8x128xf32, #tpu.memory_space<vmem>>, vector<8x128xf32>,
    %c0_7 = arith.constant 0 : index
    %c0_8 = arith.constant 0 : index
    %c0_9 = arith.constant 0 : index
    %9 = vector.load %arg6[%c0_7, %c0_8, %c0_9] : memref<13x128x128xf32, #tpu.memory_space<vmem>>, vector<1x128x128xf32>
    %10 = vector.shape_cast %9 : vector<1x128x128xf32> to vector<128x128xf32>
    %cst_10 = arith.constant dense<0.000000e+00> : vector<8x128xf32>
    %11 = tpu.matmul %0, %10, %cst_10 {dimension_numbers = #tpu.dot_dimension_numbers<[1], [0], [0], [1], [0, 0, 1, 1], [], []>} : vector<8x128xf32>, vector<128x128xf32>, vector<8x128xf32> -> vector<8x128xf32>
    %c0_11 = arith.constant 0 : index
    %c0_12 = arith.constant 0 : index
    %c0_13 = arith.constant 0 : index
    %12 = vector.load %arg7[%c0_11, %c0_12, %c0_13] : memref<18x1x128xf32, #tpu.memory_space<vmem>>, vector<1x1x128xf32>
    %13 = vector.shape_cast %12 : vector<1x1x128xf32> to vector<1x128xf32>
    %14 = vector.broadcast %13 : vector<1x128xf32> to vector<8x128xf32>
    %15 = arith.addf %11, %14 : vector<8x128xf32>
    %cst_14 = arith.constant 0.000000e+00 : f32
    %16 = vector.broadcast %cst_14 : f32 to vector<8x128xf32>
    %17 = arith.maximumf %15, %16 : vector<8x128xf32>
    %c1 = arith.constant 1 : index
    %c0_15 = arith.constant 0 : index
    %c0_16 = arith.constant 0 : index
    %18 = vector.load %arg7[%c1, %c0_15, %c0_16] : memref<18x1x128xf32, #tpu.memory_space<vmem>>, vector<1x1x128xf32>
    %19 = vector.shape_cast %18 : vector<1x1x128xf32> to vector<1x128xf32>
    %c2 = arith.constant 2 : index
    %c0_17 = arith.constant 0 : index
    %c0_18 = arith.constant 0 : index
    %20 = vector.load %arg7[%c2, %c0_17, %c0_18] : memref<18x1x128xf32, #tpu.memory_space<vmem>>, vector<1x1x128xf32>
    %21 = vector.shape_cast %20 : vector<1x1x128xf32> to vector<1x128xf32>
    %c0_19 = arith.constant 0 : index
    %c0_20 = arith.constant 0 : index
    %22 = vector.load %arg10[%c0_19, %c0_20] : memref<8x128xf32, #tpu.memory_space<vmem>>, vector<8x128xf32>
    tpu.vector_store %arg10[%c0_19, %c0_20], %17 {strides = array<i32>} : memref<8x128xf32, #tpu.memory_space<vmem>>, vector<8x128xf32>,
    %cst_21 = arith.constant 0.000000e+00 : f32
    %23 = vector.broadcast %cst_21 : f32 to vector<8x128xf32>
    %c0_22 = arith.constant 0 : index
    %c0_23 = arith.constant 0 : index
    %24 = vector.load %arg11[%c0_22, %c0_23] : memref<8x128xf32, #tpu.memory_space<vmem>>, vector<8x128xf32>
    tpu.vector_store %arg11[%c0_22, %c0_23], %23 {strides = array<i32>} : memref<8x128xf32, #tpu.memory_space<vmem>>, vector<8x128xf32>,
    %c0_i32 = arith.constant 0 : i32
    %c16_i32 = arith.constant 16 : i32
    %25 = arith.addi %c0_i32, %c16_i32 : i32
    %c1_i32 = arith.constant 1 : i32
    scf.for %arg12 = %c0_i32 to %25 step %c1_i32  : i32 {
      %186 = arith.index_cast %arg12 : i32 to index
      %187 = memref.load %arg0[%186] : memref<16xi32, #tpu.memory_space<smem>>
      %188 = arith.index_cast %arg12 : i32 to index
      %189 = memref.load %arg1[%188] : memref<16xi32, #tpu.memory_space<smem>>
      %190 = arith.index_cast %arg12 : i32 to index
      %191 = memref.load %arg2[%190] : memref<16xf32, #tpu.memory_space<smem>>
      %192 = vector.broadcast %191 : f32 to vector<1x128xf32>
      %193 = arith.mulf %192, %19 : vector<1x128xf32>
      %194 = arith.addf %193, %21 : vector<1x128xf32>
      %195 = arith.index_cast %187 : i32 to index
      %c0_150 = arith.constant 0 : index
      %196 = vector.load %arg10[%195, %c0_150] : memref<8x128xf32, #tpu.memory_space<vmem>>, vector<1x128xf32>
      %197 = arith.addf %196, %194 : vector<1x128xf32>
      %cst_151 = arith.constant 0.000000e+00 : f32
      %198 = vector.broadcast %cst_151 : f32 to vector<1x128xf32>
      %199 = arith.maximumf %197, %198 : vector<1x128xf32>
      %200 = arith.index_cast %189 : i32 to index
      %c0_152 = arith.constant 0 : index
      %201 = vector.load %arg11[%200, %c0_152] : memref<8x128xf32, #tpu.memory_space<vmem>>, vector<1x128xf32>
      %202 = arith.addf %201, %199 : vector<1x128xf32>
      %203 = arith.index_cast %189 : i32 to index
      %c0_153 = arith.constant 0 : index
      %204 = vector.load %arg11[%203, %c0_153] : memref<8x128xf32, #tpu.memory_space<vmem>>, vector<1x128xf32>
      tpu.vector_store %arg11[%203, %c0_153], %202 {strides = array<i32>} : memref<8x128xf32, #tpu.memory_space<vmem>>, vector<1x128xf32>,
    }
    %c16_i32_24 = arith.constant 16 : i32
    %c0_25 = arith.constant 0 : index
    %c0_26 = arith.constant 0 : index
    %26 = vector.load %arg11[%c0_25, %c0_26] : memref<8x128xf32, #tpu.memory_space<vmem>>, vector<8x128xf32>
    %c0_27 = arith.constant 0 : index
    %c0_28 = arith.constant 0 : index
    %27 = vector.load %arg4[%c0_27, %c0_28] : memref<8x1xf32, #tpu.memory_space<vmem>>, vector<8x1xf32>
    %28 = vector.broadcast %27 : vector<8x1xf32> to vector<8x128xf32>
    %29 = arith.mulf %26, %28 : vector<8x128xf32>
    %c1_29 = arith.constant 1 : index
    %c0_30 = arith.constant 0 : index
    %c0_31 = arith.constant 0 : index
    %30 = vector.load %arg6[%c1_29, %c0_30, %c0_31] : memref<13x128x128xf32, #tpu.memory_space<vmem>>, vector<1x128x128xf32>
    %31 = vector.shape_cast %30 : vector<1x128x128xf32> to vector<128x128xf32>
    %cst_32 = arith.constant dense<0.000000e+00> : vector<8x128xf32>
    %32 = tpu.matmul %29, %31, %cst_32 {dimension_numbers = #tpu.dot_dimension_numbers<[1], [0], [0], [1], [0, 0, 1, 1], [], []>} : vector<8x128xf32>, vector<128x128xf32>, vector<8x128xf32> -> vector<8x128xf32>
    %c3 = arith.constant 3 : index
    %c0_33 = arith.constant 0 : index
    %c0_34 = arith.constant 0 : index
    %33 = vector.load %arg7[%c3, %c0_33, %c0_34] : memref<18x1x128xf32, #tpu.memory_space<vmem>>, vector<1x1x128xf32>
    %34 = vector.shape_cast %33 : vector<1x1x128xf32> to vector<1x128xf32>
    %35 = vector.broadcast %34 : vector<1x128xf32> to vector<8x128xf32>
    %36 = arith.addf %32, %35 : vector<8x128xf32>
    %c2_35 = arith.constant 2 : index
    %c0_36 = arith.constant 0 : index
    %c0_37 = arith.constant 0 : index
    %37 = vector.load %arg6[%c2_35, %c0_36, %c0_37] : memref<13x128x128xf32, #tpu.memory_space<vmem>>, vector<1x128x128xf32>
    %38 = vector.shape_cast %37 : vector<1x128x128xf32> to vector<128x128xf32>
    %cst_38 = arith.constant dense<0.000000e+00> : vector<8x128xf32>
    %39 = tpu.matmul %17, %38, %cst_38 {dimension_numbers = #tpu.dot_dimension_numbers<[1], [0], [0], [1], [0, 0, 1, 1], [], []>} : vector<8x128xf32>, vector<128x128xf32>, vector<8x128xf32> -> vector<8x128xf32>
    %40 = arith.addf %36, %39 : vector<8x128xf32>
    %cst_39 = arith.constant 0.000000e+00 : f32
    %41 = vector.broadcast %cst_39 : f32 to vector<8x128xf32>
    %42 = arith.maximumf %40, %41 : vector<8x128xf32>
    %c3_40 = arith.constant 3 : index
    %c0_41 = arith.constant 0 : index
    %c0_42 = arith.constant 0 : index
    %43 = vector.load %arg6[%c3_40, %c0_41, %c0_42] : memref<13x128x128xf32, #tpu.memory_space<vmem>>, vector<1x128x128xf32>
    %44 = vector.shape_cast %43 : vector<1x128x128xf32> to vector<128x128xf32>
    %cst_43 = arith.constant dense<0.000000e+00> : vector<8x128xf32>
    %45 = tpu.matmul %42, %44, %cst_43 {dimension_numbers = #tpu.dot_dimension_numbers<[1], [0], [0], [1], [0, 0, 1, 1], [], []>} : vector<8x128xf32>, vector<128x128xf32>, vector<8x128xf32> -> vector<8x128xf32>
    %c4 = arith.constant 4 : index
    %c0_44 = arith.constant 0 : index
    %c0_45 = arith.constant 0 : index
    %46 = vector.load %arg7[%c4, %c0_44, %c0_45] : memref<18x1x128xf32, #tpu.memory_space<vmem>>, vector<1x1x128xf32>
    %47 = vector.shape_cast %46 : vector<1x1x128xf32> to vector<1x128xf32>
    %48 = vector.broadcast %47 : vector<1x128xf32> to vector<8x128xf32>
    %49 = arith.addf %45, %48 : vector<8x128xf32>
    %cst_46 = arith.constant 0.000000e+00 : f32
    %50 = vector.broadcast %cst_46 : f32 to vector<8x128xf32>
    %51 = arith.cmpf ogt, %49, %50 : vector<8x128xf32>
    %cst_47 = arith.constant 0.00999999977 : f32
    %52 = vector.broadcast %cst_47 : f32 to vector<8x128xf32>
    %53 = arith.mulf %52, %49 : vector<8x128xf32>
    %54 = arith.select %51, %49, %53 : vector<8x128xi1>, vector<8x128xf32>
    %c5 = arith.constant 5 : index
    %c0_48 = arith.constant 0 : index
    %c0_49 = arith.constant 0 : index
    %55 = vector.load %arg7[%c5, %c0_48, %c0_49] : memref<18x1x128xf32, #tpu.memory_space<vmem>>, vector<1x1x128xf32>
    %56 = vector.shape_cast %55 : vector<1x1x128xf32> to vector<1x128xf32>
    %c6 = arith.constant 6 : index
    %c0_50 = arith.constant 0 : index
    %c0_51 = arith.constant 0 : index
    %57 = vector.load %arg7[%c6, %c0_50, %c0_51] : memref<18x1x128xf32, #tpu.memory_space<vmem>>, vector<1x1x128xf32>
    %58 = vector.shape_cast %57 : vector<1x1x128xf32> to vector<1x128xf32>
    %c0_52 = arith.constant 0 : index
    %c0_53 = arith.constant 0 : index
    %59 = vector.load %arg10[%c0_52, %c0_53] : memref<8x128xf32, #tpu.memory_space<vmem>>, vector<8x128xf32>
    tpu.vector_store %arg10[%c0_52, %c0_53], %54 {strides = array<i32>} : memref<8x128xf32, #tpu.memory_space<vmem>>, vector<8x128xf32>,
    %cst_54 = arith.constant 0.000000e+00 : f32
    %60 = vector.broadcast %cst_54 : f32 to vector<8x128xf32>
    %c0_55 = arith.constant 0 : index
    %c0_56 = arith.constant 0 : index
    %61 = vector.load %arg11[%c0_55, %c0_56] : memref<8x128xf32, #tpu.memory_space<vmem>>, vector<8x128xf32>
    tpu.vector_store %arg11[%c0_55, %c0_56], %60 {strides = array<i32>} : memref<8x128xf32, #tpu.memory_space<vmem>>, vector<8x128xf32>,
    %c0_i32_57 = arith.constant 0 : i32
    %c16_i32_58 = arith.constant 16 : i32
    %62 = arith.addi %c0_i32_57, %c16_i32_58 : i32
    %c1_i32_59 = arith.constant 1 : i32
    scf.for %arg12 = %c0_i32_57 to %62 step %c1_i32_59  : i32 {
      %186 = arith.index_cast %arg12 : i32 to index
      %187 = memref.load %arg0[%186] : memref<16xi32, #tpu.memory_space<smem>>
      %188 = arith.index_cast %arg12 : i32 to index
      %189 = memref.load %arg1[%188] : memref<16xi32, #tpu.memory_space<smem>>
      %190 = arith.index_cast %arg12 : i32 to index
      %191 = memref.load %arg2[%190] : memref<16xf32, #tpu.memory_space<smem>>
      %192 = vector.broadcast %191 : f32 to vector<1x128xf32>
      %193 = arith.mulf %192, %56 : vector<1x128xf32>
      %194 = arith.addf %193, %58 : vector<1x128xf32>
      %195 = arith.index_cast %187 : i32 to index
      %c0_150 = arith.constant 0 : index
      %196 = vector.load %arg10[%195, %c0_150] : memref<8x128xf32, #tpu.memory_space<vmem>>, vector<1x128xf32>
      %197 = arith.addf %196, %194 : vector<1x128xf32>
      %cst_151 = arith.constant 0.000000e+00 : f32
      %198 = vector.broadcast %cst_151 : f32 to vector<1x128xf32>
      %199 = arith.maximumf %197, %198 : vector<1x128xf32>
      %200 = arith.index_cast %189 : i32 to index
      %c0_152 = arith.constant 0 : index
      %201 = vector.load %arg11[%200, %c0_152] : memref<8x128xf32, #tpu.memory_space<vmem>>, vector<1x128xf32>
      %202 = arith.addf %201, %199 : vector<1x128xf32>
      %203 = arith.index_cast %189 : i32 to index
      %c0_153 = arith.constant 0 : index
      %204 = vector.load %arg11[%203, %c0_153] : memref<8x128xf32, #tpu.memory_space<vmem>>, vector<1x128xf32>
      tpu.vector_store %arg11[%203, %c0_153], %202 {strides = array<i32>} : memref<8x128xf32, #tpu.memory_space<vmem>>, vector<1x128xf32>,
    }
    %c16_i32_60 = arith.constant 16 : i32
    %c0_61 = arith.constant 0 : index
    %c0_62 = arith.constant 0 : index
    %63 = vector.load %arg11[%c0_61, %c0_62] : memref<8x128xf32, #tpu.memory_space<vmem>>, vector<8x128xf32>
    %c0_63 = arith.constant 0 : index
    %c0_64 = arith.constant 0 : index
    %64 = vector.load %arg4[%c0_63, %c0_64] : memref<8x1xf32, #tpu.memory_space<vmem>>, vector<8x1xf32>
    %65 = vector.broadcast %64 : vector<8x1xf32> to vector<8x128xf32>
    %66 = arith.mulf %63, %65 : vector<8x128xf32>
    %c4_65 = arith.constant 4 : index
    %c0_66 = arith.constant 0 : index
    %c0_67 = arith.constant 0 : index
    %67 = vector.load %arg6[%c4_65, %c0_66, %c0_67] : memref<13x128x128xf32, #tpu.memory_space<vmem>>, vector<1x128x128xf32>
    %68 = vector.shape_cast %67 : vector<1x128x128xf32> to vector<128x128xf32>
    %cst_68 = arith.constant dense<0.000000e+00> : vector<8x128xf32>
    %69 = tpu.matmul %66, %68, %cst_68 {dimension_numbers = #tpu.dot_dimension_numbers<[1], [0], [0], [1], [0, 0, 1, 1], [], []>} : vector<8x128xf32>, vector<128x128xf32>, vector<8x128xf32> -> vector<8x128xf32>
    %c7 = arith.constant 7 : index
    %c0_69 = arith.constant 0 : index
    %c0_70 = arith.constant 0 : index
    %70 = vector.load %arg7[%c7, %c0_69, %c0_70] : memref<18x1x128xf32, #tpu.memory_space<vmem>>, vector<1x1x128xf32>
    %71 = vector.shape_cast %70 : vector<1x1x128xf32> to vector<1x128xf32>
    %72 = vector.broadcast %71 : vector<1x128xf32> to vector<8x128xf32>
    %73 = arith.addf %69, %72 : vector<8x128xf32>
    %c5_71 = arith.constant 5 : index
    %c0_72 = arith.constant 0 : index
    %c0_73 = arith.constant 0 : index
    %74 = vector.load %arg6[%c5_71, %c0_72, %c0_73] : memref<13x128x128xf32, #tpu.memory_space<vmem>>, vector<1x128x128xf32>
    %75 = vector.shape_cast %74 : vector<1x128x128xf32> to vector<128x128xf32>
    %cst_74 = arith.constant dense<0.000000e+00> : vector<8x128xf32>
    %76 = tpu.matmul %54, %75, %cst_74 {dimension_numbers = #tpu.dot_dimension_numbers<[1], [0], [0], [1], [0, 0, 1, 1], [], []>} : vector<8x128xf32>, vector<128x128xf32>, vector<8x128xf32> -> vector<8x128xf32>
    %77 = arith.addf %73, %76 : vector<8x128xf32>
    %cst_75 = arith.constant 0.000000e+00 : f32
    %78 = vector.broadcast %cst_75 : f32 to vector<8x128xf32>
    %79 = arith.maximumf %77, %78 : vector<8x128xf32>
    %c6_76 = arith.constant 6 : index
    %c0_77 = arith.constant 0 : index
    %c0_78 = arith.constant 0 : index
    %80 = vector.load %arg6[%c6_76, %c0_77, %c0_78] : memref<13x128x128xf32, #tpu.memory_space<vmem>>, vector<1x128x128xf32>
    %81 = vector.shape_cast %80 : vector<1x128x128xf32> to vector<128x128xf32>
    %cst_79 = arith.constant dense<0.000000e+00> : vector<8x128xf32>
    %82 = tpu.matmul %79, %81, %cst_79 {dimension_numbers = #tpu.dot_dimension_numbers<[1], [0], [0], [1], [0, 0, 1, 1], [], []>} : vector<8x128xf32>, vector<128x128xf32>, vector<8x128xf32> -> vector<8x128xf32>
    %c8 = arith.constant 8 : index
    %c0_80 = arith.constant 0 : index
    %c0_81 = arith.constant 0 : index
    %83 = vector.load %arg7[%c8, %c0_80, %c0_81] : memref<18x1x128xf32, #tpu.memory_space<vmem>>, vector<1x1x128xf32>
    %84 = vector.shape_cast %83 : vector<1x1x128xf32> to vector<1x128xf32>
    %85 = vector.broadcast %84 : vector<1x128xf32> to vector<8x128xf32>
    %86 = arith.addf %82, %85 : vector<8x128xf32>
    %cst_82 = arith.constant 0.000000e+00 : f32
    %87 = vector.broadcast %cst_82 : f32 to vector<8x128xf32>
    %88 = arith.cmpf ogt, %86, %87 : vector<8x128xf32>
    %cst_83 = arith.constant 0.00999999977 : f32
    %89 = vector.broadcast %cst_83 : f32 to vector<8x128xf32>
    %90 = arith.mulf %89, %86 : vector<8x128xf32>
    %91 = arith.select %88, %86, %90 : vector<8x128xi1>, vector<8x128xf32>
    %c9 = arith.constant 9 : index
    %c0_84 = arith.constant 0 : index
    %c0_85 = arith.constant 0 : index
    %92 = vector.load %arg7[%c9, %c0_84, %c0_85] : memref<18x1x128xf32, #tpu.memory_space<vmem>>, vector<1x1x128xf32>
    %93 = vector.shape_cast %92 : vector<1x1x128xf32> to vector<1x128xf32>
    %c10 = arith.constant 10 : index
    %c0_86 = arith.constant 0 : index
    %c0_87 = arith.constant 0 : index
    %94 = vector.load %arg7[%c10, %c0_86, %c0_87] : memref<18x1x128xf32, #tpu.memory_space<vmem>>, vector<1x1x128xf32>
    %95 = vector.shape_cast %94 : vector<1x1x128xf32> to vector<1x128xf32>
    %c0_88 = arith.constant 0 : index
    %c0_89 = arith.constant 0 : index
    %96 = vector.load %arg10[%c0_88, %c0_89] : memref<8x128xf32, #tpu.memory_space<vmem>>, vector<8x128xf32>
    tpu.vector_store %arg10[%c0_88, %c0_89], %91 {strides = array<i32>} : memref<8x128xf32, #tpu.memory_space<vmem>>, vector<8x128xf32>,
    %cst_90 = arith.constant 0.000000e+00 : f32
    %97 = vector.broadcast %cst_90 : f32 to vector<8x128xf32>
    %c0_91 = arith.constant 0 : index
    %c0_92 = arith.constant 0 : index
    %98 = vector.load %arg11[%c0_91, %c0_92] : memref<8x128xf32, #tpu.memory_space<vmem>>, vector<8x128xf32>
    tpu.vector_store %arg11[%c0_91, %c0_92], %97 {strides = array<i32>} : memref<8x128xf32, #tpu.memory_space<vmem>>, vector<8x128xf32>,
    %c0_i32_93 = arith.constant 0 : i32
    %c16_i32_94 = arith.constant 16 : i32
    %99 = arith.addi %c0_i32_93, %c16_i32_94 : i32
    %c1_i32_95 = arith.constant 1 : i32
    scf.for %arg12 = %c0_i32_93 to %99 step %c1_i32_95  : i32 {
      %186 = arith.index_cast %arg12 : i32 to index
      %187 = memref.load %arg0[%186] : memref<16xi32, #tpu.memory_space<smem>>
      %188 = arith.index_cast %arg12 : i32 to index
      %189 = memref.load %arg1[%188] : memref<16xi32, #tpu.memory_space<smem>>
      %190 = arith.index_cast %arg12 : i32 to index
      %191 = memref.load %arg2[%190] : memref<16xf32, #tpu.memory_space<smem>>
      %192 = vector.broadcast %191 : f32 to vector<1x128xf32>
      %193 = arith.mulf %192, %93 : vector<1x128xf32>
      %194 = arith.addf %193, %95 : vector<1x128xf32>
      %195 = arith.index_cast %187 : i32 to index
      %c0_150 = arith.constant 0 : index
      %196 = vector.load %arg10[%195, %c0_150] : memref<8x128xf32, #tpu.memory_space<vmem>>, vector<1x128xf32>
      %197 = arith.addf %196, %194 : vector<1x128xf32>
      %cst_151 = arith.constant 0.000000e+00 : f32
      %198 = vector.broadcast %cst_151 : f32 to vector<1x128xf32>
      %199 = arith.maximumf %197, %198 : vector<1x128xf32>
      %200 = arith.index_cast %189 : i32 to index
      %c0_152 = arith.constant 0 : index
      %201 = vector.load %arg11[%200, %c0_152] : memref<8x128xf32, #tpu.memory_space<vmem>>, vector<1x128xf32>
      %202 = arith.addf %201, %199 : vector<1x128xf32>
      %203 = arith.index_cast %189 : i32 to index
      %c0_153 = arith.constant 0 : index
      %204 = vector.load %arg11[%203, %c0_153] : memref<8x128xf32, #tpu.memory_space<vmem>>, vector<1x128xf32>
      tpu.vector_store %arg11[%203, %c0_153], %202 {strides = array<i32>} : memref<8x128xf32, #tpu.memory_space<vmem>>, vector<1x128xf32>,
    }
    %c16_i32_96 = arith.constant 16 : i32
    %c0_97 = arith.constant 0 : index
    %c0_98 = arith.constant 0 : index
    %100 = vector.load %arg11[%c0_97, %c0_98] : memref<8x128xf32, #tpu.memory_space<vmem>>, vector<8x128xf32>
    %c0_99 = arith.constant 0 : index
    %c0_100 = arith.constant 0 : index
    %101 = vector.load %arg4[%c0_99, %c0_100] : memref<8x1xf32, #tpu.memory_space<vmem>>, vector<8x1xf32>
    %102 = vector.broadcast %101 : vector<8x1xf32> to vector<8x128xf32>
    %103 = arith.mulf %100, %102 : vector<8x128xf32>
    %c7_101 = arith.constant 7 : index
    %c0_102 = arith.constant 0 : index
    %c0_103 = arith.constant 0 : index
    %104 = vector.load %arg6[%c7_101, %c0_102, %c0_103] : memref<13x128x128xf32, #tpu.memory_space<vmem>>, vector<1x128x128xf32>
    %105 = vector.shape_cast %104 : vector<1x128x128xf32> to vector<128x128xf32>
    %cst_104 = arith.constant dense<0.000000e+00> : vector<8x128xf32>
    %106 = tpu.matmul %103, %105, %cst_104 {dimension_numbers = #tpu.dot_dimension_numbers<[1], [0], [0], [1], [0, 0, 1, 1], [], []>} : vector<8x128xf32>, vector<128x128xf32>, vector<8x128xf32> -> vector<8x128xf32>
    %c11 = arith.constant 11 : index
    %c0_105 = arith.constant 0 : index
    %c0_106 = arith.constant 0 : index
    %107 = vector.load %arg7[%c11, %c0_105, %c0_106] : memref<18x1x128xf32, #tpu.memory_space<vmem>>, vector<1x1x128xf32>
    %108 = vector.shape_cast %107 : vector<1x1x128xf32> to vector<1x128xf32>
    %109 = vector.broadcast %108 : vector<1x128xf32> to vector<8x128xf32>
    %110 = arith.addf %106, %109 : vector<8x128xf32>
    %c8_107 = arith.constant 8 : index
    %c0_108 = arith.constant 0 : index
    %c0_109 = arith.constant 0 : index
    %111 = vector.load %arg6[%c8_107, %c0_108, %c0_109] : memref<13x128x128xf32, #tpu.memory_space<vmem>>, vector<1x128x128xf32>
    %112 = vector.shape_cast %111 : vector<1x128x128xf32> to vector<128x128xf32>
    %cst_110 = arith.constant dense<0.000000e+00> : vector<8x128xf32>
    %113 = tpu.matmul %91, %112, %cst_110 {dimension_numbers = #tpu.dot_dimension_numbers<[1], [0], [0], [1], [0, 0, 1, 1], [], []>} : vector<8x128xf32>, vector<128x128xf32>, vector<8x128xf32> -> vector<8x128xf32>
    %114 = arith.addf %110, %113 : vector<8x128xf32>
    %cst_111 = arith.constant 0.000000e+00 : f32
    %115 = vector.broadcast %cst_111 : f32 to vector<8x128xf32>
    %116 = arith.maximumf %114, %115 : vector<8x128xf32>
    %c9_112 = arith.constant 9 : index
    %c0_113 = arith.constant 0 : index
    %c0_114 = arith.constant 0 : index
    %117 = vector.load %arg6[%c9_112, %c0_113, %c0_114] : memref<13x128x128xf32, #tpu.memory_space<vmem>>, vector<1x128x128xf32>
    %118 = vector.shape_cast %117 : vector<1x128x128xf32> to vector<128x128xf32>
    %cst_115 = arith.constant dense<0.000000e+00> : vector<8x128xf32>
    %119 = tpu.matmul %116, %118, %cst_115 {dimension_numbers = #tpu.dot_dimension_numbers<[1], [0], [0], [1], [0, 0, 1, 1], [], []>} : vector<8x128xf32>, vector<128x128xf32>, vector<8x128xf32> -> vector<8x128xf32>
    %c12_116 = arith.constant 12 : index
    %c0_117 = arith.constant 0 : index
    %c0_118 = arith.constant 0 : index
    %120 = vector.load %arg7[%c12_116, %c0_117, %c0_118] : memref<18x1x128xf32, #tpu.memory_space<vmem>>, vector<1x1x128xf32>
    %121 = vector.shape_cast %120 : vector<1x1x128xf32> to vector<1x128xf32>
    %122 = vector.broadcast %121 : vector<1x128xf32> to vector<8x128xf32>
    %123 = arith.addf %119, %122 : vector<8x128xf32>
    %cst_119 = arith.constant 0.000000e+00 : f32
    %124 = vector.broadcast %cst_119 : f32 to vector<8x128xf32>
    %125 = arith.cmpf ogt, %123, %124 : vector<8x128xf32>
    %cst_120 = arith.constant 0.00999999977 : f32
    %126 = vector.broadcast %cst_120 : f32 to vector<8x128xf32>
    %127 = arith.mulf %126, %123 : vector<8x128xf32>
    %128 = arith.select %125, %123, %127 : vector<8x128xi1>, vector<8x128xf32>
    %c0_121 = arith.constant 0 : index
    %c0_122 = arith.constant 0 : index
    %129 = vector.load %arg5[%c0_121, %c0_122] : memref<8x8xf32, #tpu.memory_space<vmem>>, vector<8x8xf32>
    %cst_123 = arith.constant dense<0.000000e+00> : vector<8x128xf32>
    %130 = tpu.matmul %129, %128, %cst_123 {dimension_numbers = #tpu.dot_dimension_numbers<[1], [0], [0], [1], [0, 0, 1, 1], [], []>} : vector<8x8xf32>, vector<8x128xf32>, vector<8x128xf32> -> vector<8x128xf32>
    %c10_124 = arith.constant 10 : index
    %c0_125 = arith.constant 0 : index
    %c0_126 = arith.constant 0 : index
    %131 = vector.load %arg6[%c10_124, %c0_125, %c0_126] : memref<13x128x128xf32, #tpu.memory_space<vmem>>, vector<1x128x128xf32>
    %132 = vector.shape_cast %131 : vector<1x128x128xf32> to vector<128x128xf32>
    %cst_127 = arith.constant dense<0.000000e+00> : vector<8x128xf32>
    %133 = tpu.matmul %130, %132, %cst_127 {dimension_numbers = #tpu.dot_dimension_numbers<[1], [0], [0], [1], [0, 0, 1, 1], [], []>} : vector<8x128xf32>, vector<128x128xf32>, vector<8x128xf32> -> vector<8x128xf32>
    %c13 = arith.constant 13 : index
    %c0_128 = arith.constant 0 : index
    %c0_129 = arith.constant 0 : index
    %134 = vector.load %arg7[%c13, %c0_128, %c0_129] : memref<18x1x128xf32, #tpu.memory_space<vmem>>, vector<1x1x128xf32>
    %135 = vector.shape_cast %134 : vector<1x1x128xf32> to vector<1x128xf32>
    %136 = vector.broadcast %135 : vector<1x128xf32> to vector<8x128xf32>
    %137 = arith.addf %133, %136 : vector<8x128xf32>
    %138 = tpu.iota {dimensions = array<i32: 0>} : vector<8x128xi32>
    %c2_i32 = arith.constant 2 : i32
    %139 = vector.broadcast %c2_i32 : i32 to vector<8x128xi32>
    %140 = arith.cmpi slt, %138, %139 : vector<8x128xi32>
    %141 = arith.extui %140 : vector<8x128xi1> to vector<8x128xi32>
    %142 = arith.sitofp %141 : vector<8x128xi32> to vector<8x128xf32>
    %143 = arith.mulf %137, %142 : vector<8x128xf32>
    %cst_130 = arith.constant dense<0.000000e+00> : vector<128xf32>
    %144 = vector.multi_reduction <add>, %143, %cst_130 [0] : vector<8x128xf32> to vector<128xf32>
    %145 = vector.shape_cast %144 : vector<128xf32> to vector<1x128xf32>
    %cst_131 = arith.constant 5.000000e-01 : f32
    %146 = vector.broadcast %cst_131 : f32 to vector<1x128xf32>
    %147 = arith.mulf %145, %146 : vector<1x128xf32>
    %148 = vector.broadcast %147 : vector<1x128xf32> to vector<8x128xf32>
    %149 = arith.subf %137, %148 : vector<8x128xf32>
    %150 = arith.mulf %149, %142 : vector<8x128xf32>
    %151 = arith.mulf %150, %150 : vector<8x128xf32>
    %cst_132 = arith.constant dense<0.000000e+00> : vector<128xf32>
    %152 = vector.multi_reduction <add>, %151, %cst_132 [0] : vector<8x128xf32> to vector<128xf32>
    %153 = vector.shape_cast %152 : vector<128xf32> to vector<1x128xf32>
    %cst_133 = arith.constant 5.000000e-01 : f32
    %154 = vector.broadcast %cst_133 : f32 to vector<1x128xf32>
    %155 = arith.mulf %153, %154 : vector<1x128xf32>
    %156 = vector.broadcast %147 : vector<1x128xf32> to vector<8x128xf32>
    %157 = arith.subf %137, %156 : vector<8x128xf32>
    %cst_134 = arith.constant 9.99999974E-6 : f32
    %158 = vector.broadcast %cst_134 : f32 to vector<1x128xf32>
    %159 = arith.addf %155, %158 : vector<1x128xf32>
    %160 = math.rsqrt %159 : vector<1x128xf32>
    %161 = vector.broadcast %160 : vector<1x128xf32> to vector<8x128xf32>
    %162 = arith.mulf %157, %161 : vector<8x128xf32>
    %c14 = arith.constant 14 : index
    %c0_135 = arith.constant 0 : index
    %c0_136 = arith.constant 0 : index
    %163 = vector.load %arg7[%c14, %c0_135, %c0_136] : memref<18x1x128xf32, #tpu.memory_space<vmem>>, vector<1x1x128xf32>
    %164 = vector.shape_cast %163 : vector<1x1x128xf32> to vector<1x128xf32>
    %165 = vector.broadcast %164 : vector<1x128xf32> to vector<8x128xf32>
    %166 = arith.mulf %162, %165 : vector<8x128xf32>
    %c15 = arith.constant 15 : index
    %c0_137 = arith.constant 0 : index
    %c0_138 = arith.constant 0 : index
    %167 = vector.load %arg7[%c15, %c0_137, %c0_138] : memref<18x1x128xf32, #tpu.memory_space<vmem>>, vector<1x1x128xf32>
    %168 = vector.shape_cast %167 : vector<1x1x128xf32> to vector<1x128xf32>
    %169 = vector.broadcast %168 : vector<1x128xf32> to vector<8x128xf32>
    %170 = arith.addf %166, %169 : vector<8x128xf32>
    %cst_139 = arith.constant 0.000000e+00 : f32
    %171 = vector.broadcast %cst_139 : f32 to vector<8x128xf32>
    %172 = arith.cmpf ogt, %170, %171 : vector<8x128xf32>
    %cst_140 = arith.constant 0.00999999977 : f32
    %173 = vector.broadcast %cst_140 : f32 to vector<8x128xf32>
    %174 = arith.mulf %173, %170 : vector<8x128xf32>
    %175 = arith.select %172, %170, %174 : vector<8x128xi1>, vector<8x128xf32>
    %c11_141 = arith.constant 11 : index
    %c0_142 = arith.constant 0 : index
    %c0_143 = arith.constant 0 : index
    %176 = vector.load %arg6[%c11_141, %c0_142, %c0_143] : memref<13x128x128xf32, #tpu.memory_space<vmem>>, vector<1x128x128xf32>
    %177 = vector.shape_cast %176 : vector<1x128x128xf32> to vector<128x128xf32>
    %cst_144 = arith.constant dense<0.000000e+00> : vector<8x128xf32>
    %178 = tpu.matmul %175, %177, %cst_144 {dimension_numbers = #tpu.dot_dimension_numbers<[1], [0], [0], [1], [0, 0, 1, 1], [], []>} : vector<8x128xf32>, vector<128x128xf32>, vector<8x128xf32> -> vector<8x128xf32>
    %c16 = arith.constant 16 : index
    %c0_145 = arith.constant 0 : index
    %c0_146 = arith.constant 0 : index
    %179 = vector.load %arg7[%c16, %c0_145, %c0_146] : memref<18x1x128xf32, #tpu.memory_space<vmem>>, vector<1x1x128xf32>
    %180 = vector.shape_cast %179 : vector<1x1x128xf32> to vector<1x128xf32>
    %181 = vector.broadcast %180 : vector<1x128xf32> to vector<8x128xf32>
    %182 = arith.addf %178, %181 : vector<8x128xf32>
    %cst_147 = arith.constant 0.000000e+00 : f32
    %183 = vector.broadcast %cst_147 : f32 to vector<8x128xf32>
    %184 = arith.maximumf %182, %183 : vector<8x128xf32>
    %c0_148 = arith.constant 0 : index
    %c0_149 = arith.constant 0 : index
    %185 = vector.load %arg9[%c0_148, %c0_149] : memref<8x128xf32, #tpu.memory_space<vmem>>, vector<8x128xf32>
    tpu.vector_store %arg9[%c0_148, %c0_149], %184 {strides = array<i32>} : memref<8x128xf32, #tpu.memory_space<vmem>>, vector<8x128xf32>,
    return
  }
}

</mosaic_0001>

<bundles_post_ra>
// kernel: tpu_custom_call.1
= control target key start
LH: loop header
LB: loop body
LE: loop exit
PB: predicated region body
PF: predicated region fallthrough
CT: control target
= control target key end

     0   :  { %15 = vsyncpa [#allocation7], 0  ;;  %s3152_s0 = inlined_call_operand.hbm [shape: s32[16], index: 0, kind: input, shape index: {}]   ;;  %s3153_s1 = inlined_call_operand.hbm [shape: s32[16], index: 1, kind: input, shape index: {}]   ;;  %s3154_s2 = inlined_call_operand.hbm [shape: f32[16], index: 2, kind: input, shape index: {}]   ;;  %s3155_s3 = inlined_call_operand.vmem [shape: f32[8,128], index: 3, kind: input, shape index: {}]   ;;  %s3156_s4 = inlined_call_operand.vmem [shape: f32[8,1], index: 4, kind: input, shape index: {}]   ;;  %s3157_s5 = inlined_call_operand.vmem [shape: f32[8,8], index: 5, kind: input, shape index: {}]   ;;  %s3158_s6 = inlined_call_operand.hbm [shape: f32[13,128,128], index: 6, kind: input, shape index: {}]   ;;  %s3159_s7 = inlined_call_operand.vmem [shape: f32[18,1,128], index: 7, kind: input, shape index: {}]   ;;  %s3160_s8 = inlined_call_operand.hbm [shape: f32[8,128], index: 8, kind: output, shape index: {0}]   ;;  %s3161_s9 = inlined_call_operand.hbm [shape: f32[8,128], index: 9, kind: output, shape index: {1}]  }
   0x1   :  { %16 = vsyncpa [#allocation9], 0 }
   0x2   :  { %17 = vsyncpa [#allocation5], 0 }
   0x3   :  { %18 = vsyncpa [#allocation6], 0 }
   0x4   :  { %19 = vsyncpa [#allocation14], 0  ;;  %s2658_s11 = scalar_lea.hbm %s3153_s1, 16 }
   0x5   :  { %p2659_p0 = scmp.ne.s32.totalorder %s3153_s1, %s2658_s11  ;;  %p2662_p1 = scmp.lt.u32.totalorder %s2658_s11, %s3153_s1 }
   0x7   :  { %p2664_p2 = pnand %p2662_p1, %p2659_p0 }
   0x9   :  { %2667 = shalt.err (!%p2664_p2)
}
   0xa   :  { %s2788_s16 = smov [#allocation8]   ;;  %s2668_s21 = scalar_lea.hbm %s3152_s0, 16 }
   0xb   :  { %35 = dma.hbm_to_smem %s3153_s1, 16, %s2788_s16, [#allocation9]  }
   0xc   :  { %p2669_p3 = scmp.ne.s32.totalorder %s3152_s0, %s2668_s21  ;;  %p2672_p4 = scmp.lt.u32.totalorder %s2668_s21, %s3152_s0 }
   0xe   :  { %p2674_p5 = pnand %p2672_p4, %p2669_p3 }
  0x10   :  { %2677 = shalt.err (!%p2674_p5)
}
  0x11   :  { %s2789_s26 = smov [#allocation4]   ;;  %s2678_s30 = scalar_lea.hbm %s3154_s2, 16 }
  0x12   :  { %27 = dma.hbm_to_smem %s3152_s0, 16, %s2789_s26, [#allocation7]  }
  0x13   :  { %p2679_p6 = scmp.ne.s32.totalorder %s3154_s2, %s2678_s30  ;;  %p2682_p7 = scmp.lt.u32.totalorder %s2678_s30, %s3154_s2 }
  0x15   :  { %p2684_p8 = pnand %p2682_p7, %p2679_p6 }
  0x17   :  { %2687 = shalt.err (!%p2684_p8)
}
  0x18   :  { %s2790_s14 = smov [#allocation10]   ;;  %s2791_s0 = smov [#allocation11]  }
  0x19   :  { %43 = dma.hbm_to_smem %s3154_s2, 16, %s2790_s14, [#allocation9]  }
  0x1a   :  { %s55_s17 = sshll.u32 %s2791_s0, 4  ;;  %s2688_s20 = scalar_lea.hbm %s3158_s6, 26624  ;;  %s56_s17 = int_to_ptr.vmem [resolvable:$true] %s55_s17 }
  0x1b   :  { %p2689_p9 = scmp.ne.s32.totalorder %s3158_s6, %s2688_s20  ;;  %p2692_p10 = scmp.lt.u32.totalorder %s2688_s20, %s3158_s6 }
  0x1d   :  { %p2694_p11 = pnand %p2692_p10, %p2689_p9 }
  0x1f   :  { %2697 = shalt.err (!%p2694_p11)
}
  0x20   :  { %s2698_s25 = scalar_lea.vmem %s56_s17, 26624  ;;  %p2703_p13 = scmp.lt.s32.totalorder %s56_s17, %s56_s17 }
  0x21   :  { %p2699_p12 = scmp.ne.s32.totalorder %s56_s17, %s2698_s25  ;;  %p2704_p0 = scmp.lt.s32.totalorder %s2698_s25, %s2698_s25 }
  0x23   :  { %p2705_p1 = por %p2704_p0, %p2703_p13 }
  0x25   :  { %p2706_p2 = pnand %p2705_p1, %p2699_p12 }
  0x27   :  { %2709 = shalt.err (!%p2706_p2)
}
  0x28   :  { %s2792_s2 = smov 128   ;;  %s2793_s26 = smov 8  }
  0x29   :  { %61 = dma.hbm_to_vmem [thread:$0]  %s3158_s6, 26624, %s56_s17, [#allocation5], %s2792_s2, %s2792_s2, %s2793_s26  }
  0x2a   :  { %2766 = dma.done.wait [#allocation7], 16  }
  0x2b   :  { %2767 = vsyncadd [#allocation7], 4294967280 }
  0x2c   :  { %2768 = dma.done.wait [#allocation9], 32  }
  0x2d   :  { %2769 = vsyncadd [#allocation9], 4294967264 }
  0x2e   :  { %2770 = dma.done.wait [#allocation5], 26624  }
  0x2f   :  { %2771 = vsyncadd [#allocation5], 4294940672 }
  0x30   :  { %76 = sfence }
  0x31   :  { %v174_v0 = vld [vmem:[#allocation11] sm:$0xff]  ;;  %v175_v1 = vld [vmem:[#allocation11 + $0x8] sm:$0xff]  ;;  %v2794_v3 = vmov 0.0|0.0   ;;  %v176_v6 = vld [vmem:[#allocation11 + $0x10] sm:$0xff]  ;;  %v2795_v8 = vmov 0.0   ;;  %vm2796_vm0 = vmmov 0  }
  0x32   :  { %v79_v2 = vld [vmem:[#allocation11 + $0x600] sm:$0xff]  ;;  %2320 = vmatprep.subr.bf16.mxu1 %v2794_v3  ;;  %2296 = vmatprep.subr.bf16.mxu0 %v2794_v3  ;;  %v2321_v4 = vpack.c.bf16 %v175_v1, %v174_v0  ;;  %v80_v5 = vld [vmem:[#allocation11 + $0x608] sm:$0xff]  ;;  %v177_v7 = vld [vmem:[#allocation11 + $0x18] sm:$0xff]  ;;  %273 = vst [vmem:[#allocation3] sm:$0xff] %v2795_v8 }
  0x33   :  { %v2297_v9 = vpack.c.bf16 %v80_v5, %v79_v2  ;;  %v81_v10 = vld [vmem:[#allocation11 + $0x610] sm:$0xff]  ;;  %v82_v11 = vld [vmem:[#allocation11 + $0x618] sm:$0xff]  ;;  %1903 = vmatprep.mubr.msk.f32.mxu1 %vm2796_vm0, %v2795_v8  ;;  %1868 = vmatprep.mubr.msk.f32.mxu0 %vm2796_vm0, %v2795_v8  ;;  %v2324_v12 = vpack.c.bf16 %v177_v7, %v176_v6  ;;  %v178_v14 = vld [vmem:[#allocation11 + $0x20] sm:$0xff] }
  0x34   :  { %2322 = vmatpush3.bf16.msra.mxu1 %v2321_v4  ;;  %v2300_v13 = vpack.c.bf16 %v82_v11, %v81_v10  ;;  %v179_v15 = vld [vmem:[#allocation11 + $0x28] sm:$0xff]  ;;  %v83_v16 = vld [vmem:[#allocation11 + $0x620] sm:$0xff]  ;;  %v180_v20 = vld [vmem:[#allocation11 + $0x30] sm:$0xff] }
  0x35   :  { %2298 = vmatpush3.bf16.msra.mxu0 %v2297_v9  ;;  %2323 = vmatprep.subr.bf16.mxu1 %v2794_v3  ;;  %v84_v17 = vld [vmem:[#allocation11 + $0x628] sm:$0xff]  ;;  %v2327_v18 = vpack.c.bf16 %v179_v15, %v178_v14  ;;  %v181_v21 = vld [vmem:[#allocation11 + $0x38] sm:$0xff]  ;;  %v85_v22 = vld [vmem:[#allocation11 + $0x630] sm:$0xff] }
  0x36   :  { %2299 = vmatprep.subr.bf16.mxu0 %v2794_v3  ;;  %v2303_v19 = vpack.c.bf16 %v84_v17, %v83_v16  ;;  %v86_v23 = vld [vmem:[#allocation11 + $0x638] sm:$0xff]  ;;  %v2330_v24 = vpack.c.bf16 %v181_v21, %v180_v20  ;;  %v182_v26 = vld [vmem:[#allocation11 + $0x40] sm:$0xff]  ;;  %v183_v27 = vld [vmem:[#allocation11 + $0x48] sm:$0xff] }
  0x37   :  { %v2306_v25 = vpack.c.bf16 %v86_v23, %v85_v22  ;;  %v87_v28 = vld [vmem:[#allocation11 + $0x640] sm:$0xff]  ;;  %v88_v29 = vld [vmem:[#allocation11 + $0x648] sm:$0xff]  ;;  %v2333_v30 = vpack.c.bf16 %v183_v27, %v182_v26  ;;  %v184_v32 = vld [vmem:[#allocation11 + $0x50] sm:$0xff] }
  0x38   :  { %2325 = vmatpush3.bf16.msra.mxu1 %v2324_v12  ;;  %v2309_v31 = vpack.c.bf16 %v88_v29, %v87_v28  ;;  %v185_v33 = vld [vmem:[#allocation11 + $0x58] sm:$0xff]  ;;  %v89_v34 = vld [vmem:[#allocation11 + $0x650] sm:$0xff]  ;;  %v186_v38 = vld [vmem:[#allocation11 + $0x60] sm:$0xff] }
  0x39   :  { %2301 = vmatpush3.bf16.msra.mxu0 %v2300_v13  ;;  %2326 = vmatprep.subr.bf16.mxu1 %v2794_v3  ;;  %v90_v35 = vld [vmem:[#allocation11 + $0x658] sm:$0xff]  ;;  %v2336_v36 = vpack.c.bf16 %v185_v33, %v184_v32  ;;  %v187_v39 = vld [vmem:[#allocation11 + $0x68] sm:$0xff]  ;;  %v91_v40 = vld [vmem:[#allocation11 + $0x660] sm:$0xff] }
  0x3a   :  { %2302 = vmatprep.subr.bf16.mxu0 %v2794_v3  ;;  %v2312_v37 = vpack.c.bf16 %v90_v35, %v89_v34  ;;  %v92_v41 = vld [vmem:[#allocation11 + $0x668] sm:$0xff]  ;;  %v2339_v42 = vpack.c.bf16 %v187_v39, %v186_v38  ;;  %v188_v44 = vld [vmem:[#allocation11 + $0x70] sm:$0xff]  ;;  %v189_v45 = vld [vmem:[#allocation11 + $0x78] sm:$0xff] }
  0x3b   :  { %v2315_v43 = vpack.c.bf16 %v92_v41, %v91_v40  ;;  %v93_v46 = vld [vmem:[#allocation11 + $0x670] sm:$0xff]  ;;  %v94_v47 = vld [vmem:[#allocation11 + $0x678] sm:$0xff]  ;;  %v2342_v48 = vpack.c.bf16 %v189_v45, %v188_v44  ;;  %v1583_v54 = vld [vmem:[%s3159_s7 + $0x11] ss:$0 sm:$0xff] }
  0x3c   :  { %2328 = vmatpush3.bf16.msra.mxu1 %v2327_v18  ;;  %v2318_v49 = vpack.c.bf16 %v94_v47, %v93_v46  ;;  %v77_v50 = vld [vmem:[%s3155_s3] sm:$0xff]  ;;  %s2776_s3 = smov 0  }
  0x3d   :  { %2304 = vmatpush3.bf16.msra.mxu0 %v2303_v19  ;;  %2329 = vmatprep.subr.bf16.mxu1 %v2794_v3  ;;  %v1585_v51 = vld [vmem:[%s3159_s7 + $0x1] sm:$0x1]  ;;  %v1586_v52 = vld [vmem:[%s3159_s7 + $0x2] sm:$0x1]  ;;  %v1584_v53 = vld [vmem:[%s3159_s7] ss:$0 sm:$0xff] }
  0x3e   :  { %2305 = vmatprep.subr.bf16.mxu0 %v2794_v3 }
  0x40   :  { %2331 = vmatpush3.bf16.msra.mxu1 %v2330_v24 }
  0x41   :  { %2307 = vmatpush3.bf16.msra.mxu0 %v2306_v25  ;;  %2332 = vmatprep.subr.bf16.mxu1 %v2794_v3 }
  0x42   :  { %2308 = vmatprep.subr.bf16.mxu0 %v2794_v3 }
  0x44   :  { %2334 = vmatpush3.bf16.msra.mxu1 %v2333_v30 }
  0x45   :  { %2310 = vmatpush3.bf16.msra.mxu0 %v2309_v31  ;;  %2335 = vmatprep.subr.bf16.mxu1 %v2794_v3 }
  0x46   :  { %2311 = vmatprep.subr.bf16.mxu0 %v2794_v3 }
  0x48   :  { %2337 = vmatpush3.bf16.msra.mxu1 %v2336_v36 }
  0x49   :  { %2313 = vmatpush3.bf16.msra.mxu0 %v2312_v37  ;;  %2338 = vmatprep.subr.bf16.mxu1 %v2794_v3 }
  0x4a   :  { %2314 = vmatprep.subr.bf16.mxu0 %v2794_v3 }
  0x4c   :  { %2340 = vmatpush3.bf16.msra.mxu1 %v2339_v42 }
  0x4d   :  { %2316 = vmatpush3.bf16.msra.mxu0 %v2315_v43  ;;  %2341 = vmatprep.subr.bf16.mxu1 %v2794_v3 }
  0x4e   :  { %2317 = vmatprep.subr.bf16.mxu0 %v2794_v3 }
  0x50   :  { %2343 = vmatpush3.bf16.msra.mxu1 %v2342_v48 }
  0x51   :  { %2319 = vmatpush3.bf16.msra.mxu0 %v2318_v49 }
  0x53   :  { %1904 = vmatmul.mubr.f32.vlgmr.msra.gmra.mrb[0].mxu1 %v77_v50 }
  0x54   :  { %1869 = vmatmul.mubr.f32.vlgmr.msra.gmra.mrb[0].mxu0 %v77_v50 }
 0x126   :  { %v263_v55 = vpop.f32.mrb[0].mxu1 }
 0x127   :  { %v2934_v56 = vadd.f32 %v1584_v53, %v263_v55  ;;  %v169_v57 = vpop.f32.mrb[0].mxu0  ;;  %v1905_v58 = vpop.f32.mrb[1].mxu1 }
 0x128   :  { %v170_v59 = vadd.f32 %v1583_v54, %v169_v57  ;;  %v1870_v60 = vpop.f32.mrb[1].mxu0 }
 0x129   :  { %v267_v61 = vmax.f32 %v2934_v56, 0.0 }
 0x12a   :  { %173 = vst [vmem:[#allocation12] sm:$0xff] %v170_v59 }
 0x12b   :  { %272 = vst [vmem:[#allocation2] sm:$0xff] %v267_v61 }
 0x12c LB: > { %s280_s16 = sld [smem:[#allocation4 + %s2778_s3]]  ;;  %s2778_s3 = sphi %s2776_s3, %s279_s3  }
 0x12d   : > { %s282_s0 = sld [smem:[#allocation10 + %s2778_s3]] }
 0x12e   : > { %s281_s17 = sld [smem:[#allocation8 + %s2778_s3]]  ;;  %s279_s3 = sadd.s32 1, %s2778_s3  }
 0x12f   : > { %p276_p3 = scmp.ge.s32.totalorder %s279_s3, 16  }
 0x130   :  { %v295_v7 = vld [vmem:[%s3156_s4] sm:$0xff] (%p276_p3)  ;;  %2344 = vmatprep.subr.bf16.mxu0 (%p276_p3), %v2794_v3  ;;  %v303_v9 = vld [vmem:[#allocation11 + $0x80] sm:$0xff] (%p276_p3)  ;;  %v304_v10 = vld [vmem:[#allocation11 + $0x88] sm:$0xff] (%p276_p3)  ;;  %1938 = vmatprep.mubr.msk.f32.mxu0 (%p276_p3), %vm2796_vm0, %v2795_v8  ;;  %v2797_v11 = vmov (%p276_p3), 0   ;;  %s2780_s6 = smov (%p276_p3), 0  }
 0x131   :  { %2653 = vset.pattern.permute.xlu0 (%p276_p3), %v2797_v11  ;;  %v2345_v12 = vpack.c.bf16 (%p276_p3), %v304_v10, %v303_v9  ;;  %v305_v13 = vld [vmem:[#allocation11 + $0x90] sm:$0xff] (%p276_p3)  ;;  %v306_v14 = vld [vmem:[#allocation11 + $0x98] sm:$0xff] (%p276_p3)  ;;  %2392 = vmatprep.subr.bf16.mxu1 (%p276_p3), %v2794_v3  ;;  %v307_v16 = vld [vmem:[#allocation11 + $0xa0] sm:$0xff] (%p276_p3) }
 0x132   : > { %s286_s18 = scalar_lea.vmem [#allocation2], %s280_s16  ;;  %298 = vperm.xlu0 (%p276_p3), %2653, %v295_v7   ;;  %2008 = vmatprep.mubr.msk.f32.mxu1 (%p276_p3), %vm2796_vm0, %v2795_v8  ;;  %v2348_v15 = vpack.c.bf16 (%p276_p3), %v306_v14, %v305_v13  ;;  %v308_v17 = vld [vmem:[#allocation11 + $0xa8] sm:$0xff] (%p276_p3)  ;;  %v309_v20 = vld [vmem:[#allocation11 + $0xb0] sm:$0xff] (%p276_p3)  ;;  %v310_v21 = vld [vmem:[#allocation11 + $0xb8] sm:$0xff] (%p276_p3) }
 0x133   : > { %v283_v62 = vstv %s282_s0  ;;  %v287_v0 = vld [vmem:[%s286_s18] sm:$0x1]  ;;  %2346 = vmatpush3.bf16.msra.mxu0 (%p276_p3), %v2345_v12  ;;  %v2351_v19 = vpack.c.bf16 (%p276_p3), %v308_v17, %v307_v16  ;;  %v2354_v22 = vpack.c.bf16 (%p276_p3), %v310_v21, %v309_v20  ;;  %v311_v23 = vld [vmem:[#allocation11 + $0xc0] sm:$0xff] (%p276_p3)  ;;  %v312_v24 = vld [vmem:[#allocation11 + $0xc8] sm:$0xff] (%p276_p3) }
 0x134   : > { %v284_v63 = vmul.f32 %v1585_v51, %v283_v62  ;;  %s290_s19 = scalar_lea.vmem [#allocation3], %s281_s17  ;;  %2347 = vmatprep.subr.bf16.mxu0 (%p276_p3), %v2794_v3  ;;  %v2357_v25 = vpack.c.bf16 (%p276_p3), %v312_v24, %v311_v23  ;;  %v313_v26 = vld [vmem:[#allocation11 + $0xd0] sm:$0xff] (%p276_p3)  ;;  %v314_v27 = vld [vmem:[#allocation11 + $0xd8] sm:$0xff] (%p276_p3)  ;;  %v315_v29 = vld [vmem:[#allocation11 + $0xe0] sm:$0xff] (%p276_p3) }
 0x135   : > { %v291_v4 = vld [vmem:[%s290_s19] sm:$0x1]  ;;  %v2360_v28 = vpack.c.bf16 (%p276_p3), %v314_v27, %v313_v26  ;;  %v316_v30 = vld [vmem:[#allocation11 + $0xe8] sm:$0xff] (%p276_p3)  ;;  %v318_v33 = vld [vmem:[#allocation11 + $0xf8] sm:$0xff] (%p276_p3) }
 0x136   : > { %v285_v1 = vadd.f32 %v1586_v52, %v284_v63  ;;  %v2363_v31 = vpack.c.bf16 (%p276_p3), %v316_v30, %v315_v29  ;;  %v317_v32 = vld [vmem:[#allocation11 + $0xf0] sm:$0xff] (%p276_p3)  ;;  %v487_v35 = vld [vmem:[#allocation11 + $0x180] sm:$0xff] (%p276_p3)  ;;  %v488_v36 = vld [vmem:[#allocation11 + $0x188] sm:$0xff] (%p276_p3) }
 0x137   :  { %2349 = vmatpush3.bf16.msra.mxu0 (%p276_p3), %v2348_v15  ;;  %v2366_v34 = vpack.c.bf16 (%p276_p3), %v318_v33, %v317_v32  ;;  %v489_v37 = vld [vmem:[#allocation11 + $0x190] sm:$0xff] (%p276_p3)  ;;  %v2393_v38 = vpack.c.bf16 (%p276_p3), %v488_v36, %v487_v35  ;;  %v490_v39 = vld [vmem:[#allocation11 + $0x198] sm:$0xff] (%p276_p3)  ;;  %v491_v41 = vld [vmem:[#allocation11 + $0x1a0] sm:$0xff] (%p276_p3) }
 0x138   : > { %v288_v2 = vadd.f32 %v287_v0, %v285_v1  ;;  %278 = sbr.rel (!%p276_p3) target bundleno = 300 (0x12c), region = 132  ;;  %2350 = vmatprep.subr.bf16.mxu0 (%p276_p3), %v2794_v3  ;;  %v2396_v40 = vpack.c.bf16 (%p276_p3), %v490_v39, %v489_v37  ;;  %v492_v42 = vld [vmem:[#allocation11 + $0x1a8] sm:$0xff] (%p276_p3)  ;;  %v493_v44 = vld [vmem:[#allocation11 + $0x1b0] sm:$0xff] (%p276_p3)  ;;  %v494_v45 = vld [vmem:[#allocation11 + $0x1b8] sm:$0xff] (%p276_p3) }
 0x139   :  { %2394 = vmatpush3.bf16.msra.mxu1 (%p276_p3), %v2393_v38  ;;  %v2399_v43 = vpack.c.bf16 (%p276_p3), %v492_v42, %v491_v41  ;;  %v2402_v46 = vpack.c.bf16 (%p276_p3), %v494_v45, %v493_v44  ;;  %v495_v47 = vld [vmem:[#allocation11 + $0x1c0] sm:$0xff] (%p276_p3)  ;;  %v496_v48 = vld [vmem:[#allocation11 + $0x1c8] sm:$0xff] (%p276_p3)  ;;  %v497_v50 = vld [vmem:[#allocation11 + $0x1d0] sm:$0xff] (%p276_p3) }
 0x13a   : > { %v289_v5 = vmax.f32 %v288_v2, 0.0  ;;  %2395 = vmatprep.subr.bf16.mxu1 (%p276_p3), %v2794_v3  ;;  %v2405_v49 = vpack.c.bf16 (%p276_p3), %v496_v48, %v495_v47  ;;  %v498_v51 = vld [vmem:[#allocation11 + $0x1d8] sm:$0xff] (%p276_p3)  ;;  %v499_v53 = vld [vmem:[#allocation11 + $0x1e0] sm:$0xff] (%p276_p3)  ;;  %v500_v54 = vld [vmem:[#allocation11 + $0x1e8] sm:$0xff] (%p276_p3) }
 0x13b   :  { %2352 = vmatpush3.bf16.msra.mxu0 (%p276_p3), %v2351_v19  ;;  %v2408_v52 = vpack.c.bf16 (%p276_p3), %v498_v51, %v497_v50  ;;  %v2411_v55 = vpack.c.bf16 (%p276_p3), %v500_v54, %v499_v53  ;;  %v398_v57 = vld [vmem:[#allocation11 + $0x100] sm:$0xff] (%p276_p3)  ;;  %v399_v58 = vld [vmem:[#allocation11 + $0x108] sm:$0xff] (%p276_p3)  ;;  %v400_v63 = vld [vmem:[#allocation11 + $0x110] sm:$0xff] (%p276_p3) }
 0x13c   : > { %v292_v6 = vadd.f32 %v291_v4, %v289_v5  ;;  %2353 = vmatprep.subr.bf16.mxu0 (%p276_p3), %v2794_v3  ;;  %v2369_v60 = vpack.c.bf16 (%p276_p3), %v399_v58, %v398_v57  ;;  %v401_v0 = vld [vmem:[#allocation11 + $0x118] sm:$0xff] (%p276_p3)  ;;  %v402_v2 = vld [vmem:[#allocation11 + $0x120] sm:$0xff] (%p276_p3)  ;;  %v403_v4 = vld [vmem:[#allocation11 + $0x128] sm:$0xff] (%p276_p3) }
 0x13d   :  { %2397 = vmatpush3.bf16.msra.mxu1 (%p276_p3), %v2396_v40  ;;  %v2372_v1 = vpack.c.bf16 (%p276_p3), %v401_v0, %v400_v63  ;;  %v2375_v5 = vpack.c.bf16 (%p276_p3), %v403_v4, %v402_v2  ;;  %v405_v7 = vld [vmem:[#allocation11 + $0x138] sm:$0xff] (%p276_p3)  ;;  %v406_v10 = vld [vmem:[#allocation11 + $0x140] sm:$0xff] (%p276_p3)  ;;  %v407_v12 = vld [vmem:[#allocation11 + $0x148] sm:$0xff] (%p276_p3) }
 0x13e   : > { %293 = vst [vmem:[%s290_s19] sm:$0x1] %v292_v6  ;;  %2398 = vmatprep.subr.bf16.mxu1 (%p276_p3), %v2794_v3  ;;  %v404_v6 = vld [vmem:[#allocation11 + $0x130] sm:$0xff] (%p276_p3)  ;;  %v2381_v13 = vpack.c.bf16 (%p276_p3), %v407_v12, %v406_v10  ;;  %v409_v15 = vld [vmem:[#allocation11 + $0x158] sm:$0xff] (%p276_p3)  ;;  %v410_v17 = vld [vmem:[#allocation11 + $0x160] sm:$0xff] (%p276_p3) }
 0x13f   :  { %2355 = vmatpush3.bf16.msra.mxu0 %v2354_v22  ;;  %v2378_v9 = vpack.c.bf16 %v405_v7, %v404_v6  ;;  %v408_v14 = vld [vmem:[#allocation11 + $0x150] sm:$0xff]  ;;  %v413_v21 = vld [vmem:[#allocation11 + $0x178] sm:$0xff] }
 0x140   :  { %2356 = vmatprep.subr.bf16.mxu0 %v2794_v3  ;;  %v2384_v16 = vpack.c.bf16 %v409_v15, %v408_v14  ;;  %v412_v20 = vld [vmem:[#allocation11 + $0x170] sm:$0xff]  ;;  %v502_v24 = vld [vmem:[#allocation11 + $0x1f8] sm:$0xff] }
 0x141   :  { %2400 = vmatpush3.bf16.msra.mxu1 %v2399_v43  ;;  %v2390_v22 = vpack.c.bf16 %v413_v21, %v412_v20  ;;  %v501_v23 = vld [vmem:[#allocation11 + $0x1f0] sm:$0xff] }
 0x142   :  { %2401 = vmatprep.subr.bf16.mxu1 %v2794_v3  ;;  %v1588_v26 = vld [vmem:[%s3159_s7 + $0x3] ss:$0 sm:$0xff]  ;;  %v1592_v56 = vld [vmem:[%s3159_s7 + $0x6] sm:$0x1] }
 0x143   :  { %2358 = vmatpush3.bf16.msra.mxu0 %v2357_v25  ;;  %v2414_v25 = vpack.c.bf16 %v502_v24, %v501_v23 }
 0x144   :  { %2359 = vmatprep.subr.bf16.mxu0 %v2794_v3 }
 0x145   :  { %v2950_v18 = vld [vmem:[#allocation3] sm:$0xff]  ;;  %2403 = vmatpush3.bf16.msra.mxu1 %v2402_v46 }
 0x146   :  { %589 = vst [vmem:[#allocation3] sm:$0xff] %v2795_v8  ;;  %2404 = vmatprep.subr.bf16.mxu1 %v2794_v3 }
 0x147   :  { %2361 = vmatpush3.bf16.msra.mxu0 %v2360_v28 }
 0x148   :  { %2362 = vmatprep.subr.bf16.mxu0 %v2794_v3 }
 0x149   :  { %2406 = vmatpush3.bf16.msra.mxu1 %v2405_v49 }
 0x14a   :  { %2407 = vmatprep.subr.bf16.mxu1 %v2794_v3 }
 0x14b   :  { %2364 = vmatpush3.bf16.msra.mxu0 %v2363_v31  ;;  %v1591_v31 = vld [vmem:[%s3159_s7 + $0x5] sm:$0x1] }
 0x14c   :  { %2365 = vmatprep.subr.bf16.mxu0 %v2794_v3 }
 0x14d   :  { %2409 = vmatpush3.bf16.msra.mxu1 %v2408_v52 }
 0x14e   :  { %2410 = vmatprep.subr.bf16.mxu1 %v2794_v3 }
 0x14f   :  { %2367 = vmatpush3.bf16.msra.mxu0 %v2366_v34 }
 0x150   :  { %2368 = vmatprep.subr.bf16.mxu0 %v2794_v3 }
 0x151   :  { %2412 = vmatpush3.bf16.msra.mxu1 %v2411_v55 }
 0x152   :  { %2413 = vmatprep.subr.bf16.mxu1 %v2794_v3 }
 0x155   :  { %2415 = vmatpush3.bf16.msra.mxu1 %v2414_v25 }
 0x1b1   :  { %v299_v59 = vpop.permute.xlu0 %298 }
 0x1b2   :  { %v301_v62 = vmul.f32 %v299_v59, %v2950_v18  ;;  %v411_v18 = vld [vmem:[#allocation11 + $0x168] sm:$0xff] }
 0x1b3   :  { %v2387_v19 = vpack.c.bf16 %v411_v18, %v410_v17 }
 0x1b4   :  { %1939 = vmatmul.mubr.f32.vlgmr.msra.gmra.mrb[2].mxu0 %v301_v62 }
 0x1b5   :  { %2370 = vmatpush3.bf16.msra.mxu0 %v2369_v60  ;;  %1973 = vmatprep.mubr.msk.f32.mxu0 %vm2796_vm0, %v2795_v8 }
 0x1b6   :  { %2371 = vmatprep.subr.bf16.mxu0 %v2794_v3 }
 0x1b9   :  { %2373 = vmatpush3.bf16.msra.mxu0 %v2372_v1 }
 0x1ba   :  { %2374 = vmatprep.subr.bf16.mxu0 %v2794_v3 }
 0x1bd   :  { %2376 = vmatpush3.bf16.msra.mxu0 %v2375_v5 }
 0x1be   :  { %2377 = vmatprep.subr.bf16.mxu0 %v2794_v3 }
 0x1c1   :  { %2379 = vmatpush3.bf16.msra.mxu0 %v2378_v9 }
 0x1c2   :  { %2380 = vmatprep.subr.bf16.mxu0 %v2794_v3 }
 0x1c5   :  { %2382 = vmatpush3.bf16.msra.mxu0 %v2381_v13 }
 0x1c6   :  { %2383 = vmatprep.subr.bf16.mxu0 %v2794_v3 }
 0x1c9   :  { %2385 = vmatpush3.bf16.msra.mxu0 %v2384_v16 }
 0x1ca   :  { %2386 = vmatprep.subr.bf16.mxu0 %v2794_v3 }
 0x1cd   :  { %2388 = vmatpush3.bf16.msra.mxu0 %v2387_v19 }
 0x1ce   :  { %2389 = vmatprep.subr.bf16.mxu0 %v2794_v3 }
 0x1d1   :  { %2391 = vmatpush3.bf16.msra.mxu0 %v2390_v22 }
 0x1d4   :  { %1974 = vmatmul.mubr.f32.vlgmr.msra.gmra.mrb[2].mxu0 %v267_v61  ;;  %v1590_v61 = vld [vmem:[%s3159_s7 + $0x4] ss:$0 sm:$0xff] }
 0x2a7   :  { %v480_v27 = vpop.f32.mrb[2].mxu0 }
 0x2a8   :  { %v2608_v28 = vadd.f32 %v1588_v26, %v480_v27  ;;  %v1975_v29 = vpop.f32.mrb[3].mxu0 }
 0x2aa   :  { %v485_v30 = vmax.f32 %v2608_v28, 0.0 }
 0x2ac   :  { %2009 = vmatmul.mubr.f32.vlgmr.msra.gmra.mrb[2].mxu1 %v485_v30 }
 0x37f   :  { %v577_v32 = vpop.f32.mrb[2].mxu1 }
 0x380   :  { %v578_v33 = vadd.f32 %v1590_v61, %v577_v32  ;;  %v2010_v34 = vpop.f32.mrb[3].mxu1 }
 0x382   :  { %vm581_vm1 = vcmp.gt.f32.partialorder %v578_v33, 0.0  ;;  %v582_v35 = vmul.f32 0.01, %v578_v33 }
 0x384   :  { %v2991_v36 = vsel %vm581_vm1, %v578_v33, %v582_v35 }
 0x385   :  { %588 = vst [vmem:[#allocation2] sm:$0xff] %v2991_v36 }
 0x386 LB: > { %s596_s1 = sld [smem:[#allocation4 + %s2782_s6]]  ;;  %s2782_s6 = sphi %s2780_s6, %s595_s6  }
 0x387   : > { %s598_s29 = sld [smem:[#allocation10 + %s2782_s6]] }
 0x388   : > { %s597_s30 = sld [smem:[#allocation8 + %s2782_s6]]  ;;  %s595_s6 = sadd.s32 1, %s2782_s6  }
 0x389   : > { %p592_p4 = scmp.ge.s32.totalorder %s595_s6, 16  }
 0x38a   :  { %2654 = vset.pattern.permute.xlu0 (%p592_p4), %v2797_v11  ;;  %v611_v45 = vld [vmem:[%s3156_s4] sm:$0xff] (%p592_p4)  ;;  %2416 = vmatprep.subr.bf16.mxu1 (%p592_p4), %v2794_v3  ;;  %v619_v46 = vld [vmem:[#allocation11 + $0x200] sm:$0xff] (%p592_p4)  ;;  %v620_v47 = vld [vmem:[#allocation11 + $0x208] sm:$0xff] (%p592_p4)  ;;  %s2784_s20 = smov (%p592_p4), 0  }
 0x38b   :  { %614 = vperm.xlu0 (%p592_p4), %2654, %v611_v45   ;;  %v2417_v48 = vpack.c.bf16 (%p592_p4), %v620_v47, %v619_v46  ;;  %v621_v49 = vld [vmem:[#allocation11 + $0x210] sm:$0xff] (%p592_p4)  ;;  %v622_v50 = vld [vmem:[#allocation11 + $0x218] sm:$0xff] (%p592_p4)  ;;  %2043 = vmatprep.mubr.msk.f32.mxu1 (%p592_p4), %vm2796_vm0, %v2795_v8  ;;  %v623_v52 = vld [vmem:[#allocation11 + $0x220] sm:$0xff] (%p592_p4) }
 0x38c   : > { %s602_s10 = scalar_lea.vmem [#allocation2], %s596_s1  ;;  %2464 = vmatprep.subr.bf16.mxu0 (%p592_p4), %v2794_v3  ;;  %2113 = vmatprep.mubr.msk.f32.mxu0 (%p592_p4), %vm2796_vm0, %v2795_v8  ;;  %v2420_v51 = vpack.c.bf16 (%p592_p4), %v622_v50, %v621_v49  ;;  %v624_v53 = vld [vmem:[#allocation11 + $0x228] sm:$0xff] (%p592_p4)  ;;  %v625_v57 = vld [vmem:[#allocation11 + $0x230] sm:$0xff] (%p592_p4)  ;;  %v626_v58 = vld [vmem:[#allocation11 + $0x238] sm:$0xff] (%p592_p4) }
 0x38d   : > { %v599_v37 = vstv %s598_s29  ;;  %v603_v39 = vld [vmem:[%s602_s10] sm:$0x1]  ;;  %2418 = vmatpush3.bf16.msra.mxu1 (%p592_p4), %v2417_v48  ;;  %v2423_v55 = vpack.c.bf16 (%p592_p4), %v624_v53, %v623_v52  ;;  %v2426_v59 = vpack.c.bf16 (%p592_p4), %v626_v58, %v625_v57  ;;  %v627_v60 = vld [vmem:[#allocation11 + $0x240] sm:$0xff] (%p592_p4)  ;;  %v628_v62 = vld [vmem:[#allocation11 + $0x248] sm:$0xff] (%p592_p4) }
 0x38e   : > { %v600_v38 = vmul.f32 %v1591_v31, %v599_v37  ;;  %s606_s11 = scalar_lea.vmem [#allocation3], %s597_s30  ;;  %2419 = vmatprep.subr.bf16.mxu1 (%p592_p4), %v2794_v3  ;;  %v2429_v63 = vpack.c.bf16 (%p592_p4), %v628_v62, %v627_v60  ;;  %v629_v0 = vld [vmem:[#allocation11 + $0x250] sm:$0xff] (%p592_p4)  ;;  %v630_v1 = vld [vmem:[#allocation11 + $0x258] sm:$0xff] (%p592_p4)  ;;  %v631_v4 = vld [vmem:[#allocation11 + $0x260] sm:$0xff] (%p592_p4) }
 0x38f   : > { %v607_v42 = vld [vmem:[%s606_s11] sm:$0x1]  ;;  %v2432_v2 = vpack.c.bf16 (%p592_p4), %v630_v1, %v629_v0  ;;  %v632_v5 = vld [vmem:[#allocation11 + $0x268] sm:$0xff] (%p592_p4)  ;;  %v634_v9 = vld [vmem:[#allocation11 + $0x278] sm:$0xff] (%p592_p4) }
 0x390   : > { %v601_v40 = vadd.f32 %v1592_v56, %v600_v38  ;;  %v2435_v6 = vpack.c.bf16 (%p592_p4), %v632_v5, %v631_v4  ;;  %v633_v7 = vld [vmem:[#allocation11 + $0x270] sm:$0xff] (%p592_p4)  ;;  %v803_v12 = vld [vmem:[#allocation11 + $0x300] sm:$0xff] (%p592_p4)  ;;  %v804_v13 = vld [vmem:[#allocation11 + $0x308] sm:$0xff] (%p592_p4) }
 0x391   :  { %2421 = vmatpush3.bf16.msra.mxu1 (%p592_p4), %v2420_v51  ;;  %v2438_v10 = vpack.c.bf16 (%p592_p4), %v634_v9, %v633_v7  ;;  %v805_v14 = vld [vmem:[#allocation11 + $0x310] sm:$0xff] (%p592_p4)  ;;  %v2465_v15 = vpack.c.bf16 (%p592_p4), %v804_v13, %v803_v12  ;;  %v806_v16 = vld [vmem:[#allocation11 + $0x318] sm:$0xff] (%p592_p4)  ;;  %v807_v18 = vld [vmem:[#allocation11 + $0x320] sm:$0xff] (%p592_p4) }
 0x392   : > { %v604_v41 = vadd.f32 %v603_v39, %v601_v40  ;;  %594 = sbr.rel (!%p592_p4) target bundleno = 902 (0x386), region = 143  ;;  %2422 = vmatprep.subr.bf16.mxu1 (%p592_p4), %v2794_v3  ;;  %v2468_v17 = vpack.c.bf16 (%p592_p4), %v806_v16, %v805_v14  ;;  %v808_v19 = vld [vmem:[#allocation11 + $0x328] sm:$0xff] (%p592_p4)  ;;  %v809_v21 = vld [vmem:[#allocation11 + $0x330] sm:$0xff] (%p592_p4)  ;;  %v810_v22 = vld [vmem:[#allocation11 + $0x338] sm:$0xff] (%p592_p4) }
 0x393   :  { %2466 = vmatpush3.bf16.msra.mxu0 (%p592_p4), %v2465_v15  ;;  %v2471_v20 = vpack.c.bf16 (%p592_p4), %v808_v19, %v807_v18  ;;  %v2474_v23 = vpack.c.bf16 (%p592_p4), %v810_v22, %v809_v21  ;;  %v811_v24 = vld [vmem:[#allocation11 + $0x340] sm:$0xff] (%p592_p4)  ;;  %v812_v25 = vld [vmem:[#allocation11 + $0x348] sm:$0xff] (%p592_p4)  ;;  %v813_v27 = vld [vmem:[#allocation11 + $0x350] sm:$0xff] (%p592_p4) }
 0x394   : > { %v605_v43 = vmax.f32 %v604_v41, 0.0  ;;  %2467 = vmatprep.subr.bf16.mxu0 (%p592_p4), %v2794_v3  ;;  %v2477_v26 = vpack.c.bf16 (%p592_p4), %v812_v25, %v811_v24  ;;  %v814_v28 = vld [vmem:[#allocation11 + $0x358] sm:$0xff] (%p592_p4)  ;;  %v815_v30 = vld [vmem:[#allocation11 + $0x360] sm:$0xff] (%p592_p4)  ;;  %v816_v31 = vld [vmem:[#allocation11 + $0x368] sm:$0xff] (%p592_p4) }
 0x395   :  { %2424 = vmatpush3.bf16.msra.mxu1 (%p592_p4), %v2423_v55  ;;  %v2480_v29 = vpack.c.bf16 (%p592_p4), %v814_v28, %v813_v27  ;;  %v2483_v56 = vpack.c.bf16 (%p592_p4), %v816_v31, %v815_v30  ;;  %v714_v61 = vld [vmem:[#allocation11 + $0x280] sm:$0xff] (%p592_p4)  ;;  %v715_v32 = vld [vmem:[#allocation11 + $0x288] sm:$0xff] (%p592_p4)  ;;  %v716_v37 = vld [vmem:[#allocation11 + $0x290] sm:$0xff] (%p592_p4) }
 0x396   : > { %v608_v44 = vadd.f32 %v607_v42, %v605_v43  ;;  %2425 = vmatprep.subr.bf16.mxu1 (%p592_p4), %v2794_v3  ;;  %v2441_v34 = vpack.c.bf16 (%p592_p4), %v715_v32, %v714_v61  ;;  %v717_v38 = vld [vmem:[#allocation11 + $0x298] sm:$0xff] (%p592_p4)  ;;  %v718_v40 = vld [vmem:[#allocation11 + $0x2a0] sm:$0xff] (%p592_p4)  ;;  %v719_v41 = vld [vmem:[#allocation11 + $0x2a8] sm:$0xff] (%p592_p4) }
 0x397   :  { %2469 = vmatpush3.bf16.msra.mxu0 (%p592_p4), %v2468_v17  ;;  %v2444_v39 = vpack.c.bf16 (%p592_p4), %v717_v38, %v716_v37  ;;  %v2447_v42 = vpack.c.bf16 (%p592_p4), %v719_v41, %v718_v40  ;;  %v720_v43 = vld [vmem:[#allocation11 + $0x2b0] sm:$0xff] (%p592_p4)  ;;  %v722_v46 = vld [vmem:[#allocation11 + $0x2c0] sm:$0xff] (%p592_p4)  ;;  %v723_v47 = vld [vmem:[#allocation11 + $0x2c8] sm:$0xff] (%p592_p4) }
 0x398   : > { %609 = vst [vmem:[%s606_s11] sm:$0x1] %v608_v44  ;;  %2470 = vmatprep.subr.bf16.mxu0 (%p592_p4), %v2794_v3  ;;  %v721_v44 = vld [vmem:[#allocation11 + $0x2b8] sm:$0xff] (%p592_p4)  ;;  %v2453_v48 = vpack.c.bf16 (%p592_p4), %v723_v47, %v722_v46  ;;  %v724_v49 = vld [vmem:[#allocation11 + $0x2d0] sm:$0xff] (%p592_p4)  ;;  %v726_v52 = vld [vmem:[#allocation11 + $0x2e0] sm:$0xff] (%p592_p4) }
 0x399   :  { %2427 = vmatpush3.bf16.msra.mxu1 %v2426_v59  ;;  %v2450_v45 = vpack.c.bf16 %v721_v44, %v720_v43  ;;  %v725_v50 = vld [vmem:[#allocation11 + $0x2d8] sm:$0xff]  ;;  %v727_v53 = vld [vmem:[#allocation11 + $0x2e8] sm:$0xff]  ;;  %v728_v55 = vld [vmem:[#allocation11 + $0x2f0] sm:$0xff] }
 0x39a   :  { %2428 = vmatprep.subr.bf16.mxu1 %v2794_v3  ;;  %v2456_v51 = vpack.c.bf16 %v725_v50, %v724_v49  ;;  %v729_v57 = vld [vmem:[#allocation11 + $0x2f8] sm:$0xff]  ;;  %v817_v59 = vld [vmem:[#allocation11 + $0x370] sm:$0xff] }
 0x39b   :  { %2472 = vmatpush3.bf16.msra.mxu0 %v2471_v20  ;;  %v2462_v58 = vpack.c.bf16 %v729_v57, %v728_v55  ;;  %v818_v60 = vld [vmem:[#allocation11 + $0x378] sm:$0xff] }
 0x39c   :  { %2473 = vmatprep.subr.bf16.mxu0 %v2794_v3  ;;  %v2486_v62 = vpack.c.bf16 %v818_v60, %v817_v59  ;;  %v1597_v5 = vld [vmem:[%s3159_s7 + $0x9] sm:$0x1] }
 0x39d   :  { %2430 = vmatpush3.bf16.msra.mxu1 %v2429_v63  ;;  %v1594_v63 = vld [vmem:[%s3159_s7 + $0x7] ss:$0 sm:$0xff] }
 0x39e   :  { %2431 = vmatprep.subr.bf16.mxu1 %v2794_v3 }
 0x39f   :  { %v3005_v54 = vld [vmem:[#allocation3] sm:$0xff]  ;;  %2475 = vmatpush3.bf16.msra.mxu0 %v2474_v23 }
 0x3a0   :  { %905 = vst [vmem:[#allocation3] sm:$0xff] %v2795_v8  ;;  %2476 = vmatprep.subr.bf16.mxu0 %v2794_v3 }
 0x3a1   :  { %2433 = vmatpush3.bf16.msra.mxu1 %v2432_v2 }
 0x3a2   :  { %2434 = vmatprep.subr.bf16.mxu1 %v2794_v3 }
 0x3a3   :  { %2478 = vmatpush3.bf16.msra.mxu0 %v2477_v26 }
 0x3a4   :  { %2479 = vmatprep.subr.bf16.mxu0 %v2794_v3 }
 0x3a5   :  { %2436 = vmatpush3.bf16.msra.mxu1 %v2435_v6  ;;  %v1596_v6 = vld [vmem:[%s3159_s7 + $0x8] ss:$0 sm:$0xff] }
 0x3a6   :  { %2437 = vmatprep.subr.bf16.mxu1 %v2794_v3 }
 0x3a7   :  { %2481 = vmatpush3.bf16.msra.mxu0 %v2480_v29 }
 0x3a8   :  { %2482 = vmatprep.subr.bf16.mxu0 %v2794_v3 }
 0x3a9   :  { %2439 = vmatpush3.bf16.msra.mxu1 %v2438_v10 }
 0x3aa   :  { %2440 = vmatprep.subr.bf16.mxu1 %v2794_v3 }
 0x3ab   :  { %2484 = vmatpush3.bf16.msra.mxu0 %v2483_v56 }
 0x3ac   :  { %2485 = vmatprep.subr.bf16.mxu0 %v2794_v3 }
 0x3af   :  { %2487 = vmatpush3.bf16.msra.mxu0 %v2486_v62 }
 0x40a   :  { %v615_v33 = vpop.permute.xlu0 %614 }
 0x40b   :  { %v617_v35 = vmul.f32 %v615_v33, %v3005_v54  ;;  %v2459_v54 = vpack.c.bf16 %v727_v53, %v726_v52 }
 0x40d   :  { %2044 = vmatmul.mubr.f32.vlgmr.msra.gmra.mrb[4].mxu1 %v617_v35 }
 0x40e   :  { %2442 = vmatpush3.bf16.msra.mxu1 %v2441_v34  ;;  %2078 = vmatprep.mubr.msk.f32.mxu1 %vm2796_vm0, %v2795_v8 }
 0x40f   :  { %2443 = vmatprep.subr.bf16.mxu1 %v2794_v3 }
 0x412   :  { %2445 = vmatpush3.bf16.msra.mxu1 %v2444_v39 }
 0x413   :  { %2446 = vmatprep.subr.bf16.mxu1 %v2794_v3 }
 0x416   :  { %2448 = vmatpush3.bf16.msra.mxu1 %v2447_v42 }
 0x417   :  { %2449 = vmatprep.subr.bf16.mxu1 %v2794_v3 }
 0x41a   :  { %2451 = vmatpush3.bf16.msra.mxu1 %v2450_v45 }
 0x41b   :  { %2452 = vmatprep.subr.bf16.mxu1 %v2794_v3 }
 0x41e   :  { %2454 = vmatpush3.bf16.msra.mxu1 %v2453_v48 }
 0x41f   :  { %2455 = vmatprep.subr.bf16.mxu1 %v2794_v3 }
 0x422   :  { %2457 = vmatpush3.bf16.msra.mxu1 %v2456_v51 }
 0x423   :  { %2458 = vmatprep.subr.bf16.mxu1 %v2794_v3 }
 0x426   :  { %2460 = vmatpush3.bf16.msra.mxu1 %v2459_v54 }
 0x427   :  { %2461 = vmatprep.subr.bf16.mxu1 %v2794_v3 }
 0x42a   :  { %2463 = vmatpush3.bf16.msra.mxu1 %v2462_v58 }
 0x42d   :  { %2079 = vmatmul.mubr.f32.vlgmr.msra.gmra.mrb[4].mxu1 %v2991_v36  ;;  %v1598_v36 = vld [vmem:[%s3159_s7 + $0xa] sm:$0x1] }
 0x500   :  { %v796_v0 = vpop.f32.mrb[4].mxu1 }
 0x501   :  { %v2609_v1 = vadd.f32 %v1594_v63, %v796_v0  ;;  %v2080_v2 = vpop.f32.mrb[5].mxu1 }
 0x503   :  { %v801_v4 = vmax.f32 %v2609_v1, 0.0 }
 0x505   :  { %2114 = vmatmul.mubr.f32.vlgmr.msra.gmra.mrb[4].mxu0 %v801_v4 }
 0x5d8   :  { %v893_v7 = vpop.f32.mrb[4].mxu0 }
 0x5d9   :  { %v894_v9 = vadd.f32 %v1596_v6, %v893_v7  ;;  %v2115_v10 = vpop.f32.mrb[5].mxu0 }
 0x5db   :  { %vm897_vm2 = vcmp.gt.f32.partialorder %v894_v9, 0.0  ;;  %v898_v12 = vmul.f32 0.01, %v894_v9 }
 0x5dd   :  { %v3045_v13 = vsel %vm897_vm2, %v894_v9, %v898_v12 }
 0x5de   :  { %904 = vst [vmem:[#allocation2] sm:$0xff] %v3045_v13 }
 0x5df LB: > { %s912_s21 = sld [smem:[#allocation4 + %s2786_s20]]  ;;  %s2786_s20 = sphi %s2784_s20, %s911_s20  }
 0x5e0   : > { %s914_s22 = sld [smem:[#allocation10 + %s2786_s20]] }
 0x5e1   : > { %s913_s23 = sld [smem:[#allocation8 + %s2786_s20]]  ;;  %s911_s20 = sadd.s32 1, %s2786_s20  }
 0x5e2   : > { %p908_p5 = scmp.ge.s32.totalorder %s911_s20, 16  }
 0x5e3   :  { %2655 = vset.pattern.permute.xlu0 (%p908_p5), %v2797_v11  ;;  %v927_v22 = vld [vmem:[%s3156_s4] sm:$0xff] (%p908_p5)  ;;  %2488 = vmatprep.subr.bf16.mxu0 (%p908_p5), %v2794_v3  ;;  %v935_v23 = vld [vmem:[#allocation11 + $0x380] sm:$0xff] (%p908_p5)  ;;  %v936_v24 = vld [vmem:[#allocation11 + $0x388] sm:$0xff] (%p908_p5)  ;;  %vm1217_vm4 = vcmask (%p908_p5), 64512   ;;  %s2798_s14 = smov (%p908_p5), [#allocation12]  }
 0x5e4   :  { %930 = vperm.xlu0 (%p908_p5), %2655, %v927_v22   ;;  %v2489_v25 = vpack.c.bf16 (%p908_p5), %v936_v24, %v935_v23  ;;  %v937_v26 = vld [vmem:[#allocation11 + $0x390] sm:$0xff] (%p908_p5)  ;;  %v938_v27 = vld [vmem:[#allocation11 + $0x398] sm:$0xff] (%p908_p5)  ;;  %2148 = vmatprep.mubr.msk.f32.mxu0 (%p908_p5), %vm2796_vm0, %v2795_v8  ;;  %v939_v28 = vld [vmem:[#allocation11 + $0x3a0] sm:$0xff] (%p908_p5)  ;;  %s1536_s15 = sshll.u32 (%p908_p5), %s2798_s14, 4  ;;  %s1537_s15 = int_to_ptr.vmem [resolvable:$true] %s1536_s15 }
 0x5e5   : > { %s918_s24 = scalar_lea.vmem [#allocation2], %s912_s21  ;;  %2536 = vmatprep.subr.bf16.mxu1 (%p908_p5), %v2794_v3  ;;  %2218 = vmatprep.mubr.msk.f32.mxu1 (%p908_p5), %vm2796_vm0, %v2795_v8  ;;  %v2492_v11 = vpack.c.bf16 (%p908_p5), %v938_v27, %v937_v26  ;;  %v940_v29 = vld [vmem:[#allocation11 + $0x3a8] sm:$0xff] (%p908_p5)  ;;  %v941_v31 = vld [vmem:[#allocation11 + $0x3b0] sm:$0xff] (%p908_p5)  ;;  %v942_v56 = vld [vmem:[#allocation11 + $0x3b8] sm:$0xff] (%p908_p5)  ;;  %s2710_s3 = scalar_lea.vmem (%p908_p5), %s1537_s15, 128 }
 0x5e6   : > { %v915_v14 = vstv %s914_s22  ;;  %v919_v16 = vld [vmem:[%s918_s24] sm:$0x1]  ;;  %2490 = vmatpush3.bf16.msra.mxu0 (%p908_p5), %v2489_v25  ;;  %v2495_v30 = vpack.c.bf16 (%p908_p5), %v940_v29, %v939_v28  ;;  %v2498_v61 = vpack.c.bf16 (%p908_p5), %v942_v56, %v941_v31  ;;  %v943_v32 = vld [vmem:[#allocation11 + $0x3c0] sm:$0xff] (%p908_p5)  ;;  %v944_v33 = vld [vmem:[#allocation11 + $0x3c8] sm:$0xff] (%p908_p5)  ;;  %p2711_p6 = scmp.ne.s32.totalorder (%p908_p5), %s1537_s15, %s2710_s3  ;;  %p2715_p7 = scmp.lt.s32.totalorder (%p908_p5), %s1537_s15, %s1537_s15 }
 0x5e7   : > { %v916_v15 = vmul.f32 %v1597_v5, %v915_v14  ;;  %s922_s25 = scalar_lea.vmem [#allocation3], %s913_s23  ;;  %2491 = vmatprep.subr.bf16.mxu0 (%p908_p5), %v2794_v3  ;;  %v2501_v34 = vpack.c.bf16 (%p908_p5), %v944_v33, %v943_v32  ;;  %v945_v35 = vld [vmem:[#allocation11 + $0x3d0] sm:$0xff] (%p908_p5)  ;;  %v946_v37 = vld [vmem:[#allocation11 + $0x3d8] sm:$0xff] (%p908_p5)  ;;  %v947_v39 = vld [vmem:[#allocation11 + $0x3e0] sm:$0xff] (%p908_p5)  ;;  %p2716_p8 = scmp.lt.s32.totalorder (%p908_p5), %s2710_s3, %s2710_s3 }
 0x5e8   : > { %v923_v19 = vld [vmem:[%s922_s25] sm:$0x1]  ;;  %v2504_v38 = vpack.c.bf16 (%p908_p5), %v946_v37, %v945_v35  ;;  %v948_v40 = vld [vmem:[#allocation11 + $0x3e8] sm:$0xff] (%p908_p5)  ;;  %v950_v43 = vld [vmem:[#allocation11 + $0x3f8] sm:$0xff] (%p908_p5) }
 0x5e9   : > { %v917_v17 = vadd.f32 %v1598_v36, %v916_v15  ;;  %v2507_v41 = vpack.c.bf16 (%p908_p5), %v948_v40, %v947_v39  ;;  %v949_v42 = vld [vmem:[#allocation11 + $0x3f0] sm:$0xff] (%p908_p5)  ;;  %v1119_v45 = vld [vmem:[#allocation11 + $0x480] sm:$0xff] (%p908_p5)  ;;  %v1120_v46 = vld [vmem:[#allocation11 + $0x488] sm:$0xff] (%p908_p5)  ;;  %p2717_p9 = por (%p908_p5), %p2716_p8, %p2715_p7 }
 0x5ea   :  { %2493 = vmatpush3.bf16.msra.mxu0 (%p908_p5), %v2492_v11  ;;  %v2510_v44 = vpack.c.bf16 (%p908_p5), %v950_v43, %v949_v42  ;;  %v1121_v47 = vld [vmem:[#allocation11 + $0x490] sm:$0xff] (%p908_p5)  ;;  %v2537_v48 = vpack.c.bf16 (%p908_p5), %v1120_v46, %v1119_v45  ;;  %v1122_v49 = vld [vmem:[#allocation11 + $0x498] sm:$0xff] (%p908_p5)  ;;  %v1123_v51 = vld [vmem:[#allocation11 + $0x4a0] sm:$0xff] (%p908_p5) }
 0x5eb   : > { %v920_v18 = vadd.f32 %v919_v16, %v917_v17  ;;  %910 = sbr.rel (!%p908_p5) target bundleno = 1503 (0x5df), region = 154  ;;  %2494 = vmatprep.subr.bf16.mxu0 (%p908_p5), %v2794_v3  ;;  %v2540_v50 = vpack.c.bf16 (%p908_p5), %v1122_v49, %v1121_v47  ;;  %v1124_v52 = vld [vmem:[#allocation11 + $0x4a8] sm:$0xff] (%p908_p5)  ;;  %v1125_v54 = vld [vmem:[#allocation11 + $0x4b0] sm:$0xff] (%p908_p5)  ;;  %v1126_v55 = vld [vmem:[#allocation11 + $0x4b8] sm:$0xff] (%p908_p5)  ;;  %p2718_p10 = pnand (%p908_p5), %p2717_p9, %p2711_p6 }
 0x5ec   :  { %2538 = vmatpush3.bf16.msra.mxu1 (%p908_p5), %v2537_v48  ;;  %v2543_v53 = vpack.c.bf16 (%p908_p5), %v1124_v52, %v1123_v51  ;;  %v2546_v57 = vpack.c.bf16 (%p908_p5), %v1126_v55, %v1125_v54  ;;  %v1127_v58 = vld [vmem:[#allocation11 + $0x4c0] sm:$0xff] (%p908_p5)  ;;  %v1128_v59 = vld [vmem:[#allocation11 + $0x4c8] sm:$0xff] (%p908_p5)  ;;  %v1129_v62 = vld [vmem:[#allocation11 + $0x4d0] sm:$0xff] (%p908_p5) }
 0x5ed   : > { %v921_v20 = vmax.f32 %v920_v18, 0.0  ;;  %2539 = vmatprep.subr.bf16.mxu1 (%p908_p5), %v2794_v3  ;;  %v2549_v60 = vpack.c.bf16 (%p908_p5), %v1128_v59, %v1127_v58  ;;  %v1130_v63 = vld [vmem:[#allocation11 + $0x4d8] sm:$0xff] (%p908_p5)  ;;  %v1131_v1 = vld [vmem:[#allocation11 + $0x4e0] sm:$0xff] (%p908_p5)  ;;  %v1132_v2 = vld [vmem:[#allocation11 + $0x4e8] sm:$0xff] (%p908_p5) }
 0x5ee   :  { %2496 = vmatpush3.bf16.msra.mxu0 (%p908_p5), %v2495_v30  ;;  %v2552_v0 = vpack.c.bf16 (%p908_p5), %v1130_v63, %v1129_v62  ;;  %v2555_v4 = vpack.c.bf16 (%p908_p5), %v1132_v2, %v1131_v1  ;;  %v1030_v5 = vld [vmem:[#allocation11 + $0x400] sm:$0xff] (%p908_p5)  ;;  %v1031_v36 = vld [vmem:[#allocation11 + $0x408] sm:$0xff] (%p908_p5)  ;;  %v1032_v12 = vld [vmem:[#allocation11 + $0x410] sm:$0xff] (%p908_p5) }
 0x5ef   : > { %v924_v21 = vadd.f32 %v923_v19, %v921_v20  ;;  %2497 = vmatprep.subr.bf16.mxu0 (%p908_p5), %v2794_v3  ;;  %v2513_v9 = vpack.c.bf16 (%p908_p5), %v1031_v36, %v1030_v5  ;;  %v1033_v14 = vld [vmem:[#allocation11 + $0x418] sm:$0xff] (%p908_p5)  ;;  %v1034_v16 = vld [vmem:[#allocation11 + $0x420] sm:$0xff] (%p908_p5)  ;;  %v1035_v17 = vld [vmem:[#allocation11 + $0x428] sm:$0xff] (%p908_p5) }
 0x5f0   :  { %2541 = vmatpush3.bf16.msra.mxu1 (%p908_p5), %v2540_v50  ;;  %v2516_v15 = vpack.c.bf16 (%p908_p5), %v1033_v14, %v1032_v12  ;;  %v2519_v18 = vpack.c.bf16 (%p908_p5), %v1035_v17, %v1034_v16  ;;  %v1036_v19 = vld [vmem:[#allocation11 + $0x430] sm:$0xff] (%p908_p5)  ;;  %v1037_v20 = vld [vmem:[#allocation11 + $0x438] sm:$0xff] (%p908_p5)  ;;  %v1038_v22 = vld [vmem:[#allocation11 + $0x440] sm:$0xff] (%p908_p5) }
 0x5f1   : > { %925 = vst [vmem:[%s922_s25] sm:$0x1] %v924_v21  ;;  %2542 = vmatprep.subr.bf16.mxu1 (%p908_p5), %v2794_v3  ;;  %v2522_v21 = vpack.c.bf16 (%p908_p5), %v1037_v20, %v1036_v19  ;;  %v1039_v23 = vld [vmem:[#allocation11 + $0x448] sm:$0xff] (%p908_p5)  ;;  %v1040_v25 = vld [vmem:[#allocation11 + $0x450] sm:$0xff] (%p908_p5)  ;;  %v1041_v26 = vld [vmem:[#allocation11 + $0x458] sm:$0xff] (%p908_p5) }
 0x5f2   :  { %2499 = vmatpush3.bf16.msra.mxu0 %v2498_v61  ;;  %v2525_v24 = vpack.c.bf16 %v1039_v23, %v1038_v22  ;;  %v2528_v27 = vpack.c.bf16 %v1041_v26, %v1040_v25  ;;  %v1042_v11 = vld [vmem:[#allocation11 + $0x460] sm:$0xff]  ;;  %v1043_v28 = vld [vmem:[#allocation11 + $0x468] sm:$0xff]  ;;  %v1044_v30 = vld [vmem:[#allocation11 + $0x470] sm:$0xff] }
 0x5f3   :  { %2500 = vmatprep.subr.bf16.mxu0 %v2794_v3  ;;  %v2531_v29 = vpack.c.bf16 %v1043_v28, %v1042_v11  ;;  %v1045_v31 = vld [vmem:[#allocation11 + $0x478] sm:$0xff]  ;;  %v1133_v61 = vld [vmem:[#allocation11 + $0x4f0] sm:$0xff]  ;;  %v1292_v43 = vld [vmem:[#allocation11 + $0x500] sm:$0xff] }
 0x5f4   :  { %2544 = vmatpush3.bf16.msra.mxu1 %v2543_v53  ;;  %v2534_v56 = vpack.c.bf16 %v1045_v31, %v1044_v30  ;;  %v1134_v32 = vld [vmem:[#allocation11 + $0x4f8] sm:$0xff]  ;;  %v1216_v46 = vld [vmem:[%s3157_s5] sm:$0xff]  ;;  %v1296_v52 = vld [vmem:[#allocation11 + $0x520] sm:$0xff] }
 0x5f5   :  { %2545 = vmatprep.subr.bf16.mxu1 %v2794_v3  ;;  %v2558_v33 = vpack.c.bf16 %v1134_v32, %v1133_v61  ;;  %v1294_v49 = vld [vmem:[#allocation11 + $0x510] sm:$0xff]  ;;  %v1295_v50 = vld [vmem:[#allocation11 + $0x518] sm:$0xff]  ;;  %v1297_v53 = vld [vmem:[#allocation11 + $0x528] sm:$0xff] }
 0x5f6   :  { %2502 = vmatpush3.bf16.msra.mxu0 %v2501_v34  ;;  %v1600_v34 = vld [vmem:[%s3159_s7 + $0xb] ss:$0 sm:$0xff]  ;;  %v2564_v51 = vpack.c.bf16 %v1295_v50, %v1294_v49  ;;  %v2567_v54 = vpack.c.bf16 %v1297_v53, %v1296_v52  ;;  %v1298_v55 = vld [vmem:[#allocation11 + $0x530] sm:$0xff]  ;;  %v1300_v59 = vld [vmem:[#allocation11 + $0x540] sm:$0xff] }
 0x5f7   :  { %2503 = vmatprep.subr.bf16.mxu0 %v2794_v3  ;;  %v1302_v63 = vld [vmem:[#allocation11 + $0x550] sm:$0xff]  ;;  %v1304_v2 = vld [vmem:[#allocation11 + $0x560] sm:$0xff]  ;;  %v1435_v14 = vld [vmem:[#allocation11 + $0x588] sm:$0xff] }
 0x5f8   :  { %2547 = vmatpush3.bf16.msra.mxu1 %v2546_v57  ;;  %v926_v6 = vld [vmem:[#allocation3] sm:$0xff]  ;;  %v1306_v36 = vld [vmem:[#allocation11 + $0x570] sm:$0xff]  ;;  %v1434_v12 = vld [vmem:[#allocation11 + $0x580] sm:$0xff] }
 0x5f9   :  { %2548 = vmatprep.subr.bf16.mxu1 %v2794_v3  ;;  %v1299_v57 = vld [vmem:[#allocation11 + $0x538] sm:$0xff]  ;;  %v1436_v16 = vld [vmem:[#allocation11 + $0x590] sm:$0xff]  ;;  %v1438_v19 = vld [vmem:[#allocation11 + $0x5a0] sm:$0xff] }
 0x5fa   :  { %2505 = vmatpush3.bf16.msra.mxu0 %v2504_v38  ;;  %v2570_v58 = vpack.c.bf16 %v1299_v57, %v1298_v55  ;;  %v1437_v17 = vld [vmem:[#allocation11 + $0x598] sm:$0xff]  ;;  %v1439_v20 = vld [vmem:[#allocation11 + $0x5a8] sm:$0xff]  ;;  %v1440_v22 = vld [vmem:[#allocation11 + $0x5b0] sm:$0xff] }
 0x5fb   :  { %2506 = vmatprep.subr.bf16.mxu0 %v2794_v3  ;;  %v1441_v23 = vld [vmem:[#allocation11 + $0x5b8] sm:$0xff]  ;;  %v1442_v25 = vld [vmem:[#allocation11 + $0x5c0] sm:$0xff]  ;;  %v1443_v26 = vld [vmem:[#allocation11 + $0x5c8] sm:$0xff] }
 0x5fc   :  { %2550 = vmatpush3.bf16.msra.mxu1 %v2549_v60  ;;  %v1301_v60 = vld [vmem:[#allocation11 + $0x548] sm:$0xff]  ;;  %v1444_v11 = vld [vmem:[#allocation11 + $0x5d0] sm:$0xff]  ;;  %v1445_v28 = vld [vmem:[#allocation11 + $0x5d8] sm:$0xff] }
 0x5fd   :  { %2551 = vmatprep.subr.bf16.mxu1 %v2794_v3  ;;  %v2573_v62 = vpack.c.bf16 %v1301_v60, %v1300_v59  ;;  %v1446_v30 = vld [vmem:[#allocation11 + $0x5e0] sm:$0xff]  ;;  %v1447_v31 = vld [vmem:[#allocation11 + $0x5e8] sm:$0xff]  ;;  %v1448_v61 = vld [vmem:[#allocation11 + $0x5f0] sm:$0xff] }
 0x5fe   :  { %2508 = vmatpush3.bf16.msra.mxu0 %v2507_v41  ;;  %v1449_v32 = vld [vmem:[#allocation11 + $0x5f8] sm:$0xff] }
 0x5ff   :  { %2509 = vmatprep.subr.bf16.mxu0 %v2794_v3  ;;  %v1608_v60 = vld [vmem:[%s3159_s7 + $0xe] ss:$0 sm:$0xff] }
 0x600   :  { %2553 = vmatpush3.bf16.msra.mxu1 %v2552_v0  ;;  %v1303_v0 = vld [vmem:[#allocation11 + $0x558] sm:$0xff] }
 0x601   :  { %2554 = vmatprep.subr.bf16.mxu1 %v2794_v3  ;;  %v2576_v1 = vpack.c.bf16 %v1303_v0, %v1302_v63  ;;  %v1610_v63 = vld [vmem:[%s3159_s7 + $0xf] ss:$0 sm:$0xff] }
 0x602   :  { %2511 = vmatpush3.bf16.msra.mxu0 %v2510_v44  ;;  %v1293_v44 = vld [vmem:[#allocation11 + $0x508] sm:$0xff] }
 0x603   :  { %2512 = vmatprep.subr.bf16.mxu0 %v2794_v3  ;;  %v2561_v47 = vpack.c.bf16 %v1293_v44, %v1292_v43 }
 0x604   :  { %2556 = vmatpush3.bf16.msra.mxu1 %v2555_v4  ;;  %v1305_v4 = vld [vmem:[#allocation11 + $0x568] sm:$0xff] }
 0x605   :  { %2557 = vmatprep.subr.bf16.mxu1 %v2794_v3  ;;  %v2579_v5 = vpack.c.bf16 %v1305_v4, %v1304_v2 }
 0x608   :  { %2559 = vmatpush3.bf16.msra.mxu1 %v2558_v33  ;;  %v2606_v33 = vpack.c.bf16 %v1449_v32, %v1448_v61 }
 0x609   :  { %2221 = vmatprep.subr.mxu1 %v2795_v8 }
 0x663   :  { %v931_v7 = vpop.permute.xlu0 %930 }
 0x664   :  { %v933_v10 = vmul.f32 %v931_v7, %v926_v6  ;;  %v1307_v6 = vld [vmem:[#allocation11 + $0x578] sm:$0xff] }
 0x665   :  { %v2582_v7 = vpack.c.bf16 %v1307_v6, %v1306_v36 }
 0x666   :  { %2149 = vmatmul.mubr.f32.vlgmr.msra.gmra.mrb[6].mxu0 %v933_v10 }
 0x667   :  { %2514 = vmatpush3.bf16.msra.mxu0 %v2513_v9  ;;  %2183 = vmatprep.mubr.msk.f32.mxu0 %vm2796_vm0, %v2795_v8 }
 0x668   :  { %2515 = vmatprep.subr.bf16.mxu0 %v2794_v3 }
 0x66b   :  { %2517 = vmatpush3.bf16.msra.mxu0 %v2516_v15  ;;  %v2585_v15 = vpack.c.bf16 %v1435_v14, %v1434_v12 }
 0x66c   :  { %2518 = vmatprep.subr.bf16.mxu0 %v2794_v3 }
 0x66f   :  { %2520 = vmatpush3.bf16.msra.mxu0 %v2519_v18  ;;  %v2588_v18 = vpack.c.bf16 %v1437_v17, %v1436_v16 }
 0x670   :  { %2521 = vmatprep.subr.bf16.mxu0 %v2794_v3 }
 0x673   :  { %2523 = vmatpush3.bf16.msra.mxu0 %v2522_v21  ;;  %v2591_v21 = vpack.c.bf16 %v1439_v20, %v1438_v19 }
 0x674   :  { %2524 = vmatprep.subr.bf16.mxu0 %v2794_v3 }
 0x677   :  { %2526 = vmatpush3.bf16.msra.mxu0 %v2525_v24  ;;  %v2594_v24 = vpack.c.bf16 %v1441_v23, %v1440_v22 }
 0x678   :  { %2527 = vmatprep.subr.bf16.mxu0 %v2794_v3 }
 0x67b   :  { %2529 = vmatpush3.bf16.msra.mxu0 %v2528_v27  ;;  %v2597_v27 = vpack.c.bf16 %v1443_v26, %v1442_v25 }
 0x67c   :  { %2530 = vmatprep.subr.bf16.mxu0 %v2794_v3 }
 0x67f   :  { %2532 = vmatpush3.bf16.msra.mxu0 %v2531_v29  ;;  %v2600_v29 = vpack.c.bf16 %v1445_v28, %v1444_v11 }
 0x680   :  { %2533 = vmatprep.subr.bf16.mxu0 %v2794_v3 }
 0x683   :  { %2535 = vmatpush3.bf16.msra.mxu0 %v2534_v56  ;;  %v2603_v56 = vpack.c.bf16 %v1447_v31, %v1446_v30 }
 0x684   :  { %2584 = vmatprep.subr.bf16.mxu0 %v2794_v3 }
 0x686   :  { %2184 = vmatmul.mubr.f32.vlgmr.msra.gmra.mrb[6].mxu0 %v3045_v13  ;;  %v1602_v13 = vld [vmem:[%s3159_s7 + $0xc] ss:$0 sm:$0xff] }
 0x687   :  { %2293 = vmatprep.mubr.msk.f32.mxu0 %vm2796_vm0, %v2795_v8  ;;  %2586 = vmatpush3.bf16.msra.mxu0 %v2585_v15 }
 0x688   :  { %2587 = vmatprep.subr.bf16.mxu0 %v2794_v3 }
 0x68b   :  { %2589 = vmatpush3.bf16.msra.mxu0 %v2588_v18 }
 0x68c   :  { %2590 = vmatprep.subr.bf16.mxu0 %v2794_v3 }
 0x68f   :  { %2592 = vmatpush3.bf16.msra.mxu0 %v2591_v21 }
 0x690   :  { %2593 = vmatprep.subr.bf16.mxu0 %v2794_v3 }
 0x693   :  { %2595 = vmatpush3.bf16.msra.mxu0 %v2594_v24 }
 0x694   :  { %2596 = vmatprep.subr.bf16.mxu0 %v2794_v3 }
 0x697   :  { %2598 = vmatpush3.bf16.msra.mxu0 %v2597_v27 }
 0x698   :  { %2599 = vmatprep.subr.bf16.mxu0 %v2794_v3 }
 0x69b   :  { %2601 = vmatpush3.bf16.msra.mxu0 %v2600_v29 }
 0x69c   :  { %2602 = vmatprep.subr.bf16.mxu0 %v2794_v3 }
 0x69f   :  { %2604 = vmatpush3.bf16.msra.mxu0 %v2603_v56 }
 0x6a0   :  { %2605 = vmatprep.subr.bf16.mxu0 %v2794_v3 }
 0x6a3   :  { %2607 = vmatpush3.bf16.msra.mxu0 %v2606_v33 }
 0x759   :  { %v1112_v35 = vpop.f32.mrb[6].mxu0 }
 0x75a   :  { %v2610_v37 = vadd.f32 %v1600_v34, %v1112_v35  ;;  %v2185_v38 = vpop.f32.mrb[7].mxu0  ;;  %v1386_v34 = vlaneseq }
 0x75c   :  { %v1117_v39 = vmax.f32 %v2610_v37, 0.0  ;;  %v1387_v35 = vshrl.u32 %v1386_v34, 7  ;;  %v1605_v37 = vld [vmem:[%s3159_s7 + $0xd] ss:$0 sm:$0xff] }
 0x75e   :  { %2219 = vmatmul.mubr.f32.vlgmr.msra.gmra.mrb[6].mxu1 %v1117_v39  ;;  %vm1388_vm5 = vcmp.lt.s32.totalorder %v1387_v35, 2 }
 0x75f   :  { %2223 = vmatprep.mubr.msk.f32.mxu1 %vm2796_vm0, %v2795_v8  ;;  %v1606_v39 = vsel %vm1388_vm5, 1.0, %v2795_v8 }
 0x831   :  { %v1209_v40 = vpop.f32.mrb[6].mxu1 }
 0x832   :  { %v1210_v41 = vadd.f32 %v1602_v13, %v1209_v40  ;;  %v2220_v42 = vpop.f32.mrb[7].mxu1 }
 0x834   :  { %vm1213_vm3 = vcmp.gt.f32.partialorder %v1210_v41, 0.0  ;;  %v1214_v45 = vmul.f32 0.01, %v1210_v41 }
 0x836   :  { %v1215_v48 = vsel %vm1213_vm3, %v1210_v41, %v1214_v45 }
 0x837   :  { %2222 = vmatpush3.msra.mxu1 %v1215_v48 }
 0x838   :  { %2224 = vmatmul.mubr.msk.f32.vlgmr.msra.gmra.mrb[8].mxu1 %vm1217_vm4, %v1216_v46  ;;  %2560 = vmatprep.subr.bf16.mxu1 %v2794_v3 }
 0x839   :  { %2562 = vmatpush3.bf16.msra.mxu1 %v2561_v47  ;;  %2258 = vmatprep.mubr.msk.f32.mxu1 %vm2796_vm0, %v2795_v8 }
 0x83a   :  { %2563 = vmatprep.subr.bf16.mxu1 %v2794_v3 }
 0x83d   :  { %2565 = vmatpush3.bf16.msra.mxu1 %v2564_v51 }
 0x83e   :  { %2566 = vmatprep.subr.bf16.mxu1 %v2794_v3 }
 0x841   :  { %2568 = vmatpush3.bf16.msra.mxu1 %v2567_v54 }
 0x842   :  { %2569 = vmatprep.subr.bf16.mxu1 %v2794_v3 }
 0x845   :  { %2571 = vmatpush3.bf16.msra.mxu1 %v2570_v58 }
 0x846   :  { %2572 = vmatprep.subr.bf16.mxu1 %v2794_v3 }
 0x849   :  { %2574 = vmatpush3.bf16.msra.mxu1 %v2573_v62 }
 0x84a   :  { %2575 = vmatprep.subr.bf16.mxu1 %v2794_v3 }
 0x84d   :  { %2577 = vmatpush3.bf16.msra.mxu1 %v2576_v1 }
 0x84e   :  { %2578 = vmatprep.subr.bf16.mxu1 %v2794_v3 }
 0x851   :  { %2580 = vmatpush3.bf16.msra.mxu1 %v2579_v5 }
 0x852   :  { %2581 = vmatprep.subr.bf16.mxu1 %v2794_v3 }
 0x855   :  { %2583 = vmatpush3.bf16.msra.mxu1 %v2582_v7 }
 0x90b   :  { %v1287_v9 = vpop.f32.mrb[8].mxu1 }
 0x90c   :  { %2259 = vmatmul.mubr.f32.vlgmr.msra.gmra.mrb[10].mxu1 %v1287_v9  ;;  %v2225_v10 = vpop.f32.mrb[9].mxu1 }
 0x9df   :  { %v1382_v38 = vpop.f32.mrb[10].mxu1 }
 0x9e0   :  { %v1383_v13 = vadd.f32 %v1605_v37, %v1382_v38  ;;  %v2260_v40 = vpop.f32.mrb[11].mxu1 }
 0x9e2   :  { %v1391_v41 = vmul.f32 %v1606_v39, %v1383_v13 }
 0x9e4   :  { %v1392_v42 = vrot.slane %v1391_v41, 4 }
 0x9e6   :  { %v1393_v43 = vadd.f32 %v1392_v42, %v1391_v41 }
 0x9e8   :  { %v1394_v44 = vrot.slane %v1393_v43, 2 }
 0x9ea   :  { %v1395_v45 = vadd.f32 %v1394_v44, %v1393_v43 }
 0x9ec   :  { %v1396_v3 = vrot.slane %v1395_v45, 1 }
 0x9ee   :  { %v1397_v46 = vadd.f32 %v1396_v3, %v1395_v45 }
 0x9f0   :  { %v1398_v47 = vmul.f32 0.5, %v1397_v46 }
 0x9f2   :  { %v1399_v48 = vsub.f32 %v1383_v13, %v1398_v47 }
 0x9f4   :  { %v1400_v49 = vmul.f32 %v1606_v39, %v1399_v48 }
 0x9f6   :  { %v1401_v50 = vmul.f32 %v1400_v49, %v1400_v49 }
 0x9f8   :  { %v1402_v51 = vrot.slane %v1401_v50, 4 }
 0x9fa   :  { %v1403_v52 = vadd.f32 %v1402_v51, %v1401_v50 }
 0x9fc   :  { %v1404_v53 = vrot.slane %v1403_v52, 2 }
 0x9fe   :  { %v1405_v54 = vadd.f32 %v1404_v53, %v1403_v52 }
 0xa00   :  { %v1406_v55 = vrot.slane %v1405_v54, 1 }
 0xa02   :  { %v1407_v57 = vadd.f32 %v1406_v55, %v1405_v54 }
 0xa04   :  { %v1408_v8 = vmul.f32 0.5, %v1407_v57 }
 0xa06   :  { %v1409_v58 = vadd.f32 1e-05, %v1408_v8 }
 0xa08   :  { %2656 = vrsqrt.f32 %v1409_v58 }
 0xa12   :  { %v2657_v59 = vpop.eup %2656 }
 0xa13   :  { %v1411_v62 = vmul.f32 %v2657_v59, %v1399_v48 }
 0xa15   :  { %v1420_v0 = vmul.f32 %v1608_v60, %v1411_v62 }
 0xa17   :  { %v1429_v1 = vadd.f32 %v1610_v63, %v1420_v0 }
 0xa19   :  { %vm1430_vm6 = vcmp.gt.f32.partialorder %v1429_v1, 0.0  ;;  %v1431_v2 = vmul.f32 0.01, %v1429_v1 }
 0xa1b   :  { %v1432_v4 = vsel %vm1430_vm6, %v1429_v1, %v1431_v2 }
 0xa1c   :  { %2294 = vmatmul.mubr.f32.vlgmr.msra.gmra.mrb[8].mxu0 %v1432_v4 }
 0xa1d   :  { %2721 = shalt.err (!%p2718_p10)
}
 0xa1e   :  { %s2722_s17 = scalar_lea.hbm %s3160_s8, 128 }
 0xa1f   :  { %p2723_p11 = scmp.ne.s32.totalorder %s3160_s8, %s2722_s17  ;;  %p2726_p12 = scmp.lt.u32.totalorder %s2722_s17, %s3160_s8 }
 0xa21   :  { %p2728_p13 = pnand %p2726_p12, %p2723_p11 }
 0xa23   :  { %2731 = shalt.err (!%p2728_p13)
}
 0xa24   :  { %1539 = dma.vmem_to_hbm [thread:$0]  %s1537_s15, 128, %s3160_s8, [#allocation6]   ;;  %v1612_v5 = vld [vmem:[%s3159_s7 + $0x10] ss:$0 sm:$0xff] }
 0xa25   :  { %s2799_s2 = smov [#allocation13]  }
 0xa26   :  { %s1546_s26 = sshll.u32 %s2799_s2, 4  ;;  %s1547_s26 = int_to_ptr.vmem [resolvable:$true] %s1546_s26 }
 0xa27   :  { %s2732_s4 = scalar_lea.vmem %s1547_s26, 128  ;;  %p2737_p1 = scmp.lt.s32.totalorder %s1547_s26, %s1547_s26 }
 0xa28   :  { %p2733_p0 = scmp.ne.s32.totalorder %s1547_s26, %s2732_s4  ;;  %p2738_p2 = scmp.lt.s32.totalorder %s2732_s4, %s2732_s4 }
 0xa2a   :  { %p2739_p3 = por %p2738_p2, %p2737_p1 }
 0xa2c   :  { %p2740_p4 = pnand %p2739_p3, %p2733_p0 }
 0xaef   :  { %v1524_v36 = vpop.f32.mrb[8].mxu0 }
 0xaf0   :  { %v1525_v6 = vadd.f32 %v1612_v5, %v1524_v36  ;;  %v2295_v7 = vpop.f32.mrb[9].mxu0 }
 0xaf2   :  { %v1528_v9 = vmax.f32 %v1525_v6, 0.0 }
 0xaf4   :  { %1529 = vst [vmem:[#allocation13] sm:$0xff] %v1528_v9 }
 0xaf5   :  { %2743 = shalt.err (!%p2740_p4)
}
 0xaf6   :  { %s2744_s28 = scalar_lea.hbm %s3161_s9, 128 }
 0xaf7   :  { %p2745_p5 = scmp.ne.s32.totalorder %s3161_s9, %s2744_s28  ;;  %p2748_p6 = scmp.lt.u32.totalorder %s2744_s28, %s3161_s9 }
 0xaf9   :  { %p2750_p7 = pnand %p2748_p6, %p2745_p5 }
 0xafb   :  { %2753 = shalt.err (!%p2750_p7)
}
 0xafc   :  { %1549 = dma.vmem_to_hbm [thread:$0]  %s1547_s26, 128, %s3161_s9, [#allocation14]  }
 0xafd   :  { %2772 = dma.done.wait [#allocation6], 128  }
 0xafe   :  { %2773 = vsyncadd [#allocation6], 4294967168 }
 0xaff   :  { %2774 = dma.done.wait [#allocation14], 128  }
 0xb00   :  { %2775 = vsyncadd [#allocation14], 4294967168 }
 0xb01   :  { %1556 = vsyncpa [#allocation5], 1 }
 0xb02   :  { %1557 = vsyncpa [#allocation6], 1 }
 0xb03   :  { %1558 = vsyncpa [#allocation14], 1 }
 0xb04   :  { %1559 = vsyncpa [#allocation7], 1 }
 0xb05   :  { %1560 = vsyncpa [#allocation9], 1 }

</bundles_post_ra>
